<compile_context>
chip_gen: v5e
topology: v5e:2x2
jax: 0.10.0
libtpu: 0.0.40
codegen_flags: <defaults>
</compile_context>

<pallas_src>
import functools

import jax
import jax.numpy as jnp
from jax.experimental import pallas as pl
from jax.experimental.pallas import tpu as pltpu

VMEM = pltpu.MemorySpace.VMEM
SMEM = pltpu.MemorySpace.SMEM


# ---------------------------------------------------------------------------
# Fully fused forward kernel.
# ---------------------------------------------------------------------------
def gtn_rec_fused_kernel(a_hbm, w1_ref, w2_ref, x_ref, ib_ref, thr_ref,
                         w0_ref, b0_ref, wih_ref, whh_ref, bl_ref,
                         h0_ref, c0_ref, slen_ref, wscore_ref,
                         out_ref, a_buf, dma_sem, *, alpha):
    f32 = jnp.float32
    bf16 = jnp.bfloat16

    E = a_hbm.shape[0]
    N = x_ref.shape[1]
    Bp, Hd = h0_ref.shape
    T = x_ref.shape[0] // Bp

    # GTConv channel-0 softmax weights (tiny, stays in VMEM / vregs).
    sw1 = jax.nn.softmax(w1_ref[...], axis=-1)          # (1, E)
    sw2 = jax.nn.softmax(w2_ref[...], axis=-1)          # (1, E)

    # --- manual double-buffered stream of A edge slabs from HBM -----------
    def start_fetch(e, slot):
        pltpu.make_async_copy(a_hbm.at[e], a_buf.at[slot], dma_sem.at[slot]).start()

    def wait_fetch(slot):
        pltpu.make_async_copy(a_hbm.at[0], a_buf.at[slot], dma_sem.at[slot]).wait()

    x = x_ref[...]                                       # (T*Bp, N) bf16

    # Pass 1:  xa = sum_e sw1[e] * (x @ A[e])            (reassociated graph op)
    start_fetch(0, 0)
    xa = jnp.zeros((T * Bp, N), f32)
    for e in range(E):                                   # static unroll, E small
        slot = e % 2
        wait_fetch(slot)
        if e + 1 < E:
            start_fetch(e + 1, (e + 1) % 2)
        xa = xa + (jnp.dot(x, a_buf[slot], preferred_element_type=f32)
                   * sw1[0:1, e:e + 1])

    # Pass 2:  gx = sum_e sw2[e] * (xa @ A[e])   ==  x @ (acc_a @ acc_b)
    xa_bf = xa.astype(bf16)
    start_fetch(0, 0)
    gx = jnp.zeros((T * Bp, N), f32)
    for e in range(E):
        slot = e % 2
        wait_fetch(slot)
        if e + 1 < E:
            start_fetch(e + 1, (e + 1) % 2)
        gx = gx + (jnp.dot(xa_bf, a_buf[slot], preferred_element_type=f32)
                   * sw2[0:1, e:e + 1])

    # --- graph-biased basket encoding + first basket linear (+ReLU) -------
    ib = jnp.maximum(ib_ref[...], 0.0)                   # (1, N) == relu(diag(I_B))
    thr = thr_ref[0, 0]                                  # SMEM scalar
    enc_graph = x.astype(f32) * ib + jnp.maximum(gx - thr, 0.0)
    enc = jnp.maximum(
        jnp.dot(enc_graph.astype(bf16), w0_ref[...], preferred_element_type=f32)
        + b0_ref[...], 0.0)                              # (T*Bp, D) f32

    # --- LSTM: one fused (D,4H) input projection hoisted out of the loop --
    # gate order follows PyTorch nn.LSTM: [i | f | g | o]
    gates_x = (jnp.dot(enc.astype(bf16), wih_ref[...],
                       preferred_element_type=f32) + bl_ref[...])   # (T*Bp, 4H)

    whh = whh_ref[...]                                   # (H, 4H) bf16
    h = h0_ref[...]                                      # (Bp, H) f32
    c = c0_ref[...]
    h_last = h
    slen = slen_ref[...]                                 # (Bp, 1) int32

    for t in range(T):                                   # static unroll, T fixed
        # sublane-aligned static row slice (Bp is a multiple of 8)
        g = gates_x[t * Bp:(t + 1) * Bp, :] + jnp.dot(
            h.astype(bf16), whh, preferred_element_type=f32)        # (Bp, 4H)
        i_g = jax.nn.sigmoid(g[:, 0 * Hd:1 * Hd])
        f_g = jax.nn.sigmoid(g[:, 1 * Hd:2 * Hd])
        g_g = jnp.tanh(g[:, 2 * Hd:3 * Hd])
        o_g = jax.nn.sigmoid(g[:, 3 * Hd:4 * Hd])
        c = f_g * c + i_g * g_g
        h = o_g * jnp.tanh(c)
        # hidden state at the last valid timestep of each sequence
        h_last = jnp.where(slen == (t + 1), h, h_last)

    # --- score head + item-bias blend --------------------------------------
    #   predict = (1-a)*p + a*(p @ relu(diag(I_B))) == p * ((1-a) + a*relu(I_B))
    p = jax.nn.sigmoid(jnp.dot(h_last.astype(bf16), wscore_ref[...],
                               preferred_element_type=f32))         # (Bp, N)
    scale = (1.0 - alpha) + alpha * ib                              # (1, N)
    out_ref[...] = p * scale


# ---------------------------------------------------------------------------
# One-time input prep (hoisted out of the per-call path; A is static).
# ---------------------------------------------------------------------------
def prepare_adjacency(A):
    # (N, N, E) -> edge-major (E, N, N), bf16 MXU operand.
    return jnp.transpose(A, (2, 0, 1)).astype(jnp.bfloat16)


# ---------------------------------------------------------------------------
# Forward wrapper: cheap layout glue (pad / transpose / reshape) + one call.
# ---------------------------------------------------------------------------
@functools.partial(jax.jit, static_argnames=("alpha",))
def gtn_rec_forward(params, A_enn, seq_len, seqs, hidden, *, alpha):
    B, T, N = seqs.shape
    E = A_enn.shape[0]
    Hd = hidden[0].shape[-1]

    # pad batch to a full sublane tile so the recurrence rows are unmasked
    Bp = max(8, -(-B // 8) * 8)
    pad = Bp - B

    seqs_p = jnp.pad(seqs, ((0, pad), (0, 0), (0, 0)))
    # (B, T, N) -> time-major rows (T*Bp, N), bf16 (binary, exact)
    x_tb = jnp.transpose(seqs_p, (1, 0, 2)).reshape(T * Bp, N).astype(jnp.bfloat16)

    h0 = jnp.pad(hidden[0][0], ((0, pad), (0, 0))).astype(jnp.float32)   # (Bp, H)
    c0 = jnp.pad(hidden[1][0], ((0, pad), (0, 0))).astype(jnp.float32)
    slen = jnp.pad(seq_len.astype(jnp.int32), ((0, pad),)).reshape(Bp, 1)

    vspec = pl.BlockSpec(memory_space=VMEM)
    predict_p = pl.pallas_call(
        functools.partial(gtn_rec_fused_kernel, alpha=float(alpha)),
        out_shape=jax.ShapeDtypeStruct((Bp, N), jnp.float32),
        in_specs=[
            pl.BlockSpec(memory_space=pl.ANY),          # A (E, N, N) bf16, HBM-resident
            vspec,                                      # gt_w1 (1, E)
            vspec,                                      # gt_w2 (1, E)
            vspec,                                      # x (T*Bp, N) bf16
            vspec,                                      # I_B (1, N)
            pl.BlockSpec(memory_space=SMEM),            # threshold (1, 1)
            vspec,                                      # W0 (N, D) bf16
            vspec,                                      # b0 (1, D)
            vspec,                                      # W_ih (D, 4H) bf16
            vspec,                                      # W_hh (H, 4H) bf16
            vspec,                                      # b_lstm (1, 4H)
            vspec,                                      # h0 (Bp, H)
            vspec,                                      # c0 (Bp, H)
            vspec,                                      # seq_len (Bp, 1) int32
            vspec,                                      # W_score (H, N) bf16
        ],
        out_specs=pl.BlockSpec(memory_space=VMEM),
        scratch_shapes=[
            pltpu.VMEM((2, N, N), jnp.bfloat16),        # double-buffered A edge slab
            pltpu.SemaphoreType.DMA((2,)),
        ],
        compiler_params=pltpu.CompilerParams(
            # plenty for the streamed design; re-derive per chip for prod N.
            vmem_limit_bytes=32 * 1024 * 1024),
    )(A_enn, params["gt_w1"], params["gt_w2"], x_tb, params["I_B"],
      params["threshold"], params["W0"], params["b0"],
      params["W_ih"], params["W_hh"], params["b_lstm"],
      h0, c0, slen, params["W_score"])
    return predict_p[:B]


# ---------------------------------------------------------------------------
# Deterministic parameter construction (synthetic; shapes follow __init__).
# ---------------------------------------------------------------------------
def make_params(key, *, num_edge, num_channels, nb_items, basket_embed_dim,
                rnn_units):
    N, E, D, H = nb_items, num_edge, basket_embed_dim, rnn_units
    ks = jax.random.split(key, 8)

    # GTConv weights: (num_channels, num_edge); only channel 0 is consumed.
    gt_w1_full = 0.1 * jax.random.normal(ks[0], (num_channels, E), jnp.float32)
    gt_w2_full = 0.1 * jax.random.normal(ks[1], (num_channels, E), jnp.float32)

    # list_linear[0]: Linear(nb_items -> D), kaiming-uniform-ish. Stored (N, D).
    b_w0 = (6.0 / N) ** 0.5
    W0 = jax.random.uniform(ks[2], (N, D), jnp.float32, -b_w0, b_w0)
    b0 = jax.random.uniform(ks[3], (1, D), jnp.float32, -1.0 / N ** 0.5,
                            1.0 / N ** 0.5)

    # LSTM layer 0, gates concatenated [i|f|g|o] along the lane axis.
    # NOTE: PyTorch keeps separate b_ih + b_hh; a single combined bias is
    # structurally equivalent (their sum).
    b_l = 1.0 / H ** 0.5
    W_ih = jax.random.uniform(ks[4], (D, 4 * H), jnp.float32, -b_l, b_l)
    W_hh = jax.random.uniform(ks[5], (H, 4 * H), jnp.float32, -b_l, b_l)
    b_lstm = jax.random.uniform(ks[6], (1, 4 * H), jnp.float32, -b_l, b_l)

    # h2item_score: Linear(H -> N, bias=False), xavier-uniform. Stored (H, N).
    b_s = (6.0 / (H + N)) ** 0.5
    W_score = jax.random.uniform(ks[7], (H, N), jnp.float32, -b_s, b_s)

    return {
        "gt_w1": gt_w1_full[0:1],                        # (1, E) channel 0
        "gt_w2": gt_w2_full[0:1],                        # (1, E)
        "W0": W0.astype(jnp.bfloat16), "b0": b0,
        "W_ih": W_ih.astype(jnp.bfloat16),
        "W_hh": W_hh.astype(jnp.bfloat16),
        "b_lstm": b_lstm,
        "W_score": W_score.astype(jnp.bfloat16),
        "I_B": jnp.ones((1, N), jnp.float32) / N,        # item_bias
        "threshold": jnp.full((1, 1), 0.001, jnp.float32),
    }


if __name__ == "__main__":
    # small synthetic config
    B = 2                 # batch
    T = 8                 # max_seq_length
    N = 16                # nb_items == num_nodes
    E = 4                 # num_edge
    C = 2                 # num_channels (only channel 0 feeds the forward pass)
    D = 32                # basket_embed_dim
    H = 32                # rnn_units
    L = 1                 # rnn_layers
    ALPHA = 0.5

    key = jax.random.PRNGKey(0)
    k_par, k_A, k_seq = jax.random.split(key, 3)

    params = make_params(k_par, num_edge=E, num_channels=C, nb_items=N,
                         basket_embed_dim=D, rnn_units=H)

    # adjacency tensor A: (num_nodes, num_nodes, num_edge), non-negative
    A = jax.random.uniform(k_A, (N, N, E), jnp.float32)
    A_enn = jax.block_until_ready(prepare_adjacency(A))   # hoisted, done once

    # binary basket sequences: (B, T, nb_items)
    seqs = (jax.random.uniform(k_seq, (B, T, N)) < 0.3).astype(jnp.float32)
    # actual sequence lengths
    seq_len = jnp.array([T, T - 3], dtype=jnp.int32)
    # init_hidden(batch_size): zeros (rnn_layers, B, rnn_units) x2
    hidden = (jnp.zeros((L, B, H), jnp.float32),
              jnp.zeros((L, B, H), jnp.float32))

    predict = gtn_rec_forward(params, A_enn, seq_len, seqs, hidden, alpha=ALPHA)
    predict = jax.block_until_ready(predict)

    assert predict.shape == (B, N) and predict.dtype == jnp.float32
    assert bool(jnp.all(jnp.isfinite(predict)))
    print("KERNEL_OK")
</pallas_src>

<mosaic_0001>
module attributes {stable_mosaic.version = 11 : i64} {
  func.func @gtn_rec_fused_kernel(%arg0: memref<4x16x16xbf16, #tpu.memory_space<any>>, %arg1: memref<1x4xf32, #tpu.memory_space<vmem>>, %arg2: memref<1x4xf32, #tpu.memory_space<vmem>>, %arg3: memref<64x16xbf16, #tpu.memory_space<vmem>>, %arg4: memref<1x16xf32, #tpu.memory_space<vmem>>, %arg5: memref<1x1xf32, #tpu.memory_space<smem>>, %arg6: memref<16x32xbf16, #tpu.memory_space<vmem>>, %arg7: memref<1x32xf32, #tpu.memory_space<vmem>>, %arg8: memref<32x128xbf16, #tpu.memory_space<vmem>>, %arg9: memref<32x128xbf16, #tpu.memory_space<vmem>>, %arg10: memref<1x128xf32, #tpu.memory_space<vmem>>, %arg11: memref<8x32xf32, #tpu.memory_space<vmem>>, %arg12: memref<8x32xf32, #tpu.memory_space<vmem>>, %arg13: memref<8x1xi32, #tpu.memory_space<vmem>>, %arg14: memref<32x16xbf16, #tpu.memory_space<vmem>>, %arg15: memref<8x16xf32, #tpu.memory_space<vmem>>, %arg16: memref<2x16x16xbf16, #tpu.memory_space<vmem>>, %arg17: memref<2x!tpu.dma_semaphore, #tpu.memory_space<semaphore_mem>>) attributes {dimension_semantics = [], scalar_prefetch = 0 : i64, scratch_operands = 2 : i64, tpu.core_type = #tpu.core_type<tc>} {
    %c0 = arith.constant 0 : index
    %c0_0 = arith.constant 0 : index
    %0 = vector.load %arg1[%c0, %c0_0] : memref<1x4xf32, #tpu.memory_space<vmem>>, vector<1x4xf32>
    %cst = arith.constant dense<0xFF800000> : vector<1xf32>
    %1 = vector.multi_reduction <maximumf>, %0, %cst [1] : vector<1x4xf32> to vector<1xf32>
    %cst_1 = arith.constant 0xFF800000 : f32
    %2 = vector.broadcast %cst_1 : f32 to vector<1xf32>
    %3 = arith.maximumf %2, %1 : vector<1xf32>
    %4 = vector.shape_cast %3 : vector<1xf32> to vector<1x1xf32>
    %5 = vector.broadcast %4 : vector<1x1xf32> to vector<1x4xf32>
    %6 = arith.subf %0, %5 : vector<1x4xf32>
    %7 = math.exp %6 : vector<1x4xf32>
    %cst_2 = arith.constant dense<0.000000e+00> : vector<1xf32>
    %8 = vector.multi_reduction <add>, %7, %cst_2 [1] : vector<1x4xf32> to vector<1xf32>
    %9 = vector.shape_cast %8 : vector<1xf32> to vector<1x1xf32>
    %10 = vector.broadcast %9 : vector<1x1xf32> to vector<1x4xf32>
    %11 = arith.divf %7, %10 : vector<1x4xf32>
    %c0_3 = arith.constant 0 : index
    %c0_4 = arith.constant 0 : index
    %12 = vector.load %arg2[%c0_3, %c0_4] : memref<1x4xf32, #tpu.memory_space<vmem>>, vector<1x4xf32>
    %cst_5 = arith.constant dense<0xFF800000> : vector<1xf32>
    %13 = vector.multi_reduction <maximumf>, %12, %cst_5 [1] : vector<1x4xf32> to vector<1xf32>
    %cst_6 = arith.constant 0xFF800000 : f32
    %14 = vector.broadcast %cst_6 : f32 to vector<1xf32>
    %15 = arith.maximumf %14, %13 : vector<1xf32>
    %16 = vector.shape_cast %15 : vector<1xf32> to vector<1x1xf32>
    %17 = vector.broadcast %16 : vector<1x1xf32> to vector<1x4xf32>
    %18 = arith.subf %12, %17 : vector<1x4xf32>
    %19 = math.exp %18 : vector<1x4xf32>
    %cst_7 = arith.constant dense<0.000000e+00> : vector<1xf32>
    %20 = vector.multi_reduction <add>, %19, %cst_7 [1] : vector<1x4xf32> to vector<1xf32>
    %21 = vector.shape_cast %20 : vector<1xf32> to vector<1x1xf32>
    %22 = vector.broadcast %21 : vector<1x1xf32> to vector<1x4xf32>
    %23 = arith.divf %19, %22 : vector<1x4xf32>
    %c0_8 = arith.constant 0 : index
    %c0_9 = arith.constant 0 : index
    %24 = vector.load %arg3[%c0_8, %c0_9] : memref<64x16xbf16, #tpu.memory_space<vmem>>, vector<64x16xbf16>
    %c0_i32 = arith.constant 0 : i32
    %c0_i32_10 = arith.constant 0 : i32
    %c0_i32_11 = arith.constant 0 : i32
    %c0_i32_12 = arith.constant 0 : i32
    %c0_i32_13 = arith.constant 0 : i32
    %25 = tpu.memref_slice %arg0[%c0_i32, %c0_i32_12, %c0_i32_13] : memref<4x16x16xbf16, #tpu.memory_space<any>> -> memref<1x16x16xbf16, #tpu.memory_space<any>>
    %26 = tpu.memref_squeeze %25 : memref<1x16x16xbf16, #tpu.memory_space<any>> -> memref<16x16xbf16, #tpu.memory_space<any>>
    %c0_i32_14 = arith.constant 0 : i32
    %c0_i32_15 = arith.constant 0 : i32
    %27 = tpu.memref_slice %arg16[%c0_i32_10, %c0_i32_14, %c0_i32_15] : memref<2x16x16xbf16, #tpu.memory_space<vmem>> -> memref<1x16x16xbf16, #tpu.memory_space<vmem>>
    %28 = tpu.memref_squeeze %27 : memref<1x16x16xbf16, #tpu.memory_space<vmem>> -> memref<16x16xbf16, #tpu.memory_space<vmem>>
    %29 = tpu.memref_slice %arg17[%c0_i32_11] : memref<2x!tpu.dma_semaphore, #tpu.memory_space<semaphore_mem>> -> memref<1x!tpu.dma_semaphore, #tpu.memory_space<semaphore_mem>>
    %30 = tpu.memref_squeeze %29 : memref<1x!tpu.dma_semaphore, #tpu.memory_space<semaphore_mem>> -> memref<!tpu.dma_semaphore, #tpu.memory_space<semaphore_mem>>
    tpu.enqueue_dma source(%26 : memref<16x16xbf16, #tpu.memory_space<any>>) target(%28 : memref<16x16xbf16, #tpu.memory_space<vmem>>) target_semaphore(%30 : memref<!tpu.dma_semaphore, #tpu.memory_space<semaphore_mem>>)
    %cst_16 = arith.constant 0.000000e+00 : f32
    %31 = vector.broadcast %cst_16 : f32 to vector<64x16xf32>
    %c0_i32_17 = arith.constant 0 : i32
    %c0_i32_18 = arith.constant 0 : i32
    %c0_i32_19 = arith.constant 0 : i32
    %c0_i32_20 = arith.constant 0 : i32
    %c0_i32_21 = arith.constant 0 : i32
    %32 = tpu.memref_slice %arg0[%c0_i32_17, %c0_i32_20, %c0_i32_21] : memref<4x16x16xbf16, #tpu.memory_space<any>> -> memref<1x16x16xbf16, #tpu.memory_space<any>>
    %33 = tpu.memref_squeeze %32 : memref<1x16x16xbf16, #tpu.memory_space<any>> -> memref<16x16xbf16, #tpu.memory_space<any>>
    %c0_i32_22 = arith.constant 0 : i32
    %c0_i32_23 = arith.constant 0 : i32
    %34 = tpu.memref_slice %arg16[%c0_i32_18, %c0_i32_22, %c0_i32_23] : memref<2x16x16xbf16, #tpu.memory_space<vmem>> -> memref<1x16x16xbf16, #tpu.memory_space<vmem>>
    %35 = tpu.memref_squeeze %34 : memref<1x16x16xbf16, #tpu.memory_space<vmem>> -> memref<16x16xbf16, #tpu.memory_space<vmem>>
    %36 = tpu.memref_slice %arg17[%c0_i32_19] : memref<2x!tpu.dma_semaphore, #tpu.memory_space<semaphore_mem>> -> memref<1x!tpu.dma_semaphore, #tpu.memory_space<semaphore_mem>>
    %37 = tpu.memref_squeeze %36 : memref<1x!tpu.dma_semaphore, #tpu.memory_space<semaphore_mem>> -> memref<!tpu.dma_semaphore, #tpu.memory_space<semaphore_mem>>
    tpu.wait_dma2 semaphore(%37 : memref<!tpu.dma_semaphore, #tpu.memory_space<semaphore_mem>>) src(%33 : memref<16x16xbf16, #tpu.memory_space<any>>) dst(%35 : memref<16x16xbf16, #tpu.memory_space<vmem>>)
    %c1_i32 = arith.constant 1 : i32
    %c1_i32_24 = arith.constant 1 : i32
    %c1_i32_25 = arith.constant 1 : i32
    %c0_i32_26 = arith.constant 0 : i32
    %c0_i32_27 = arith.constant 0 : i32
    %38 = tpu.memref_slice %arg0[%c1_i32, %c0_i32_26, %c0_i32_27] : memref<4x16x16xbf16, #tpu.memory_space<any>> -> memref<1x16x16xbf16, #tpu.memory_space<any>>
    %39 = tpu.memref_squeeze %38 : memref<1x16x16xbf16, #tpu.memory_space<any>> -> memref<16x16xbf16, #tpu.memory_space<any>>
    %c0_i32_28 = arith.constant 0 : i32
    %c0_i32_29 = arith.constant 0 : i32
    %40 = tpu.memref_slice %arg16[%c1_i32_24, %c0_i32_28, %c0_i32_29] : memref<2x16x16xbf16, #tpu.memory_space<vmem>> -> memref<1x16x16xbf16, #tpu.memory_space<vmem>>
    %41 = tpu.memref_squeeze %40 : memref<1x16x16xbf16, #tpu.memory_space<vmem>> -> memref<16x16xbf16, #tpu.memory_space<vmem>>
    %42 = tpu.memref_slice %arg17[%c1_i32_25] : memref<2x!tpu.dma_semaphore, #tpu.memory_space<semaphore_mem>> -> memref<1x!tpu.dma_semaphore, #tpu.memory_space<semaphore_mem>>
    %43 = tpu.memref_squeeze %42 : memref<1x!tpu.dma_semaphore, #tpu.memory_space<semaphore_mem>> -> memref<!tpu.dma_semaphore, #tpu.memory_space<semaphore_mem>>
    tpu.enqueue_dma source(%39 : memref<16x16xbf16, #tpu.memory_space<any>>) target(%41 : memref<16x16xbf16, #tpu.memory_space<vmem>>) target_semaphore(%43 : memref<!tpu.dma_semaphore, #tpu.memory_space<semaphore_mem>>)
    %c0_30 = arith.constant 0 : index
    %c0_31 = arith.constant 0 : index
    %c0_32 = arith.constant 0 : index
    %44 = vector.load %arg16[%c0_30, %c0_31, %c0_32] : memref<2x16x16xbf16, #tpu.memory_space<vmem>>, vector<1x16x16xbf16>
    %45 = vector.shape_cast %44 : vector<1x16x16xbf16> to vector<16x16xbf16>
    %cst_33 = arith.constant dense<0.000000e+00> : vector<64x16xf32>
    %46 = tpu.matmul %24, %45, %cst_33 {dimension_numbers = #tpu.dot_dimension_numbers<[1], [0], [0], [1], [0, 0, 1, 1], [], []>} : vector<64x16xbf16>, vector<16x16xbf16>, vector<64x16xf32> -> vector<64x16xf32>
    %47 = vector.extract_strided_slice %11 {offsets = [0, 0], sizes = [1, 1], strides = [1, 1]} : vector<1x4xf32> to vector<1x1xf32>
    %48 = vector.broadcast %47 : vector<1x1xf32> to vector<64x16xf32>
    %49 = arith.mulf %46, %48 : vector<64x16xf32>
    %50 = arith.addf %31, %49 : vector<64x16xf32>
    %c0_i32_34 = arith.constant 0 : i32
    %c1_i32_35 = arith.constant 1 : i32
    %c1_i32_36 = arith.constant 1 : i32
    %c0_i32_37 = arith.constant 0 : i32
    %c0_i32_38 = arith.constant 0 : i32
    %51 = tpu.memref_slice %arg0[%c0_i32_34, %c0_i32_37, %c0_i32_38] : memref<4x16x16xbf16, #tpu.memory_space<any>> -> memref<1x16x16xbf16, #tpu.memory_space<any>>
    %52 = tpu.memref_squeeze %51 : memref<1x16x16xbf16, #tpu.memory_space<any>> -> memref<16x16xbf16, #tpu.memory_space<any>>
    %c0_i32_39 = arith.constant 0 : i32
    %c0_i32_40 = arith.constant 0 : i32
    %53 = tpu.memref_slice %arg16[%c1_i32_35, %c0_i32_39, %c0_i32_40] : memref<2x16x16xbf16, #tpu.memory_space<vmem>> -> memref<1x16x16xbf16, #tpu.memory_space<vmem>>
    %54 = tpu.memref_squeeze %53 : memref<1x16x16xbf16, #tpu.memory_space<vmem>> -> memref<16x16xbf16, #tpu.memory_space<vmem>>
    %55 = tpu.memref_slice %arg17[%c1_i32_36] : memref<2x!tpu.dma_semaphore, #tpu.memory_space<semaphore_mem>> -> memref<1x!tpu.dma_semaphore, #tpu.memory_space<semaphore_mem>>
    %56 = tpu.memref_squeeze %55 : memref<1x!tpu.dma_semaphore, #tpu.memory_space<semaphore_mem>> -> memref<!tpu.dma_semaphore, #tpu.memory_space<semaphore_mem>>
    tpu.wait_dma2 semaphore(%56 : memref<!tpu.dma_semaphore, #tpu.memory_space<semaphore_mem>>) src(%52 : memref<16x16xbf16, #tpu.memory_space<any>>) dst(%54 : memref<16x16xbf16, #tpu.memory_space<vmem>>)
    %c2_i32 = arith.constant 2 : i32
    %c0_i32_41 = arith.constant 0 : i32
    %c0_i32_42 = arith.constant 0 : i32
    %c0_i32_43 = arith.constant 0 : i32
    %c0_i32_44 = arith.constant 0 : i32
    %57 = tpu.memref_slice %arg0[%c2_i32, %c0_i32_43, %c0_i32_44] : memref<4x16x16xbf16, #tpu.memory_space<any>> -> memref<1x16x16xbf16, #tpu.memory_space<any>>
    %58 = tpu.memref_squeeze %57 : memref<1x16x16xbf16, #tpu.memory_space<any>> -> memref<16x16xbf16, #tpu.memory_space<any>>
    %c0_i32_45 = arith.constant 0 : i32
    %c0_i32_46 = arith.constant 0 : i32
    %59 = tpu.memref_slice %arg16[%c0_i32_41, %c0_i32_45, %c0_i32_46] : memref<2x16x16xbf16, #tpu.memory_space<vmem>> -> memref<1x16x16xbf16, #tpu.memory_space<vmem>>
    %60 = tpu.memref_squeeze %59 : memref<1x16x16xbf16, #tpu.memory_space<vmem>> -> memref<16x16xbf16, #tpu.memory_space<vmem>>
    %61 = tpu.memref_slice %arg17[%c0_i32_42] : memref<2x!tpu.dma_semaphore, #tpu.memory_space<semaphore_mem>> -> memref<1x!tpu.dma_semaphore, #tpu.memory_space<semaphore_mem>>
    %62 = tpu.memref_squeeze %61 : memref<1x!tpu.dma_semaphore, #tpu.memory_space<semaphore_mem>> -> memref<!tpu.dma_semaphore, #tpu.memory_space<semaphore_mem>>
    tpu.enqueue_dma source(%58 : memref<16x16xbf16, #tpu.memory_space<any>>) target(%60 : memref<16x16xbf16, #tpu.memory_space<vmem>>) target_semaphore(%62 : memref<!tpu.dma_semaphore, #tpu.memory_space<semaphore_mem>>)
    %c1 = arith.constant 1 : index
    %c0_47 = arith.constant 0 : index
    %c0_48 = arith.constant 0 : index
    %63 = vector.load %arg16[%c1, %c0_47, %c0_48] : memref<2x16x16xbf16, #tpu.memory_space<vmem>>, vector<1x16x16xbf16>
    %64 = vector.shape_cast %63 : vector<1x16x16xbf16> to vector<16x16xbf16>
    %cst_49 = arith.constant dense<0.000000e+00> : vector<64x16xf32>
    %65 = tpu.matmul %24, %64, %cst_49 {dimension_numbers = #tpu.dot_dimension_numbers<[1], [0], [0], [1], [0, 0, 1, 1], [], []>} : vector<64x16xbf16>, vector<16x16xbf16>, vector<64x16xf32> -> vector<64x16xf32>
    %66 = vector.extract_strided_slice %11 {offsets = [0, 1], sizes = [1, 1], strides = [1, 1]} : vector<1x4xf32> to vector<1x1xf32>
    %67 = vector.broadcast %66 : vector<1x1xf32> to vector<64x16xf32>
    %68 = arith.mulf %65, %67 : vector<64x16xf32>
    %69 = arith.addf %50, %68 : vector<64x16xf32>
    %c0_i32_50 = arith.constant 0 : i32
    %c0_i32_51 = arith.constant 0 : i32
    %c0_i32_52 = arith.constant 0 : i32
    %c0_i32_53 = arith.constant 0 : i32
    %c0_i32_54 = arith.constant 0 : i32
    %70 = tpu.memref_slice %arg0[%c0_i32_50, %c0_i32_53, %c0_i32_54] : memref<4x16x16xbf16, #tpu.memory_space<any>> -> memref<1x16x16xbf16, #tpu.memory_space<any>>
    %71 = tpu.memref_squeeze %70 : memref<1x16x16xbf16, #tpu.memory_space<any>> -> memref<16x16xbf16, #tpu.memory_space<any>>
    %c0_i32_55 = arith.constant 0 : i32
    %c0_i32_56 = arith.constant 0 : i32
    %72 = tpu.memref_slice %arg16[%c0_i32_51, %c0_i32_55, %c0_i32_56] : memref<2x16x16xbf16, #tpu.memory_space<vmem>> -> memref<1x16x16xbf16, #tpu.memory_space<vmem>>
    %73 = tpu.memref_squeeze %72 : memref<1x16x16xbf16, #tpu.memory_space<vmem>> -> memref<16x16xbf16, #tpu.memory_space<vmem>>
    %74 = tpu.memref_slice %arg17[%c0_i32_52] : memref<2x!tpu.dma_semaphore, #tpu.memory_space<semaphore_mem>> -> memref<1x!tpu.dma_semaphore, #tpu.memory_space<semaphore_mem>>
    %75 = tpu.memref_squeeze %74 : memref<1x!tpu.dma_semaphore, #tpu.memory_space<semaphore_mem>> -> memref<!tpu.dma_semaphore, #tpu.memory_space<semaphore_mem>>
    tpu.wait_dma2 semaphore(%75 : memref<!tpu.dma_semaphore, #tpu.memory_space<semaphore_mem>>) src(%71 : memref<16x16xbf16, #tpu.memory_space<any>>) dst(%73 : memref<16x16xbf16, #tpu.memory_space<vmem>>)
    %c3_i32 = arith.constant 3 : i32
    %c1_i32_57 = arith.constant 1 : i32
    %c1_i32_58 = arith.constant 1 : i32
    %c0_i32_59 = arith.constant 0 : i32
    %c0_i32_60 = arith.constant 0 : i32
    %76 = tpu.memref_slice %arg0[%c3_i32, %c0_i32_59, %c0_i32_60] : memref<4x16x16xbf16, #tpu.memory_space<any>> -> memref<1x16x16xbf16, #tpu.memory_space<any>>
    %77 = tpu.memref_squeeze %76 : memref<1x16x16xbf16, #tpu.memory_space<any>> -> memref<16x16xbf16, #tpu.memory_space<any>>
    %c0_i32_61 = arith.constant 0 : i32
    %c0_i32_62 = arith.constant 0 : i32
    %78 = tpu.memref_slice %arg16[%c1_i32_57, %c0_i32_61, %c0_i32_62] : memref<2x16x16xbf16, #tpu.memory_space<vmem>> -> memref<1x16x16xbf16, #tpu.memory_space<vmem>>
    %79 = tpu.memref_squeeze %78 : memref<1x16x16xbf16, #tpu.memory_space<vmem>> -> memref<16x16xbf16, #tpu.memory_space<vmem>>
    %80 = tpu.memref_slice %arg17[%c1_i32_58] : memref<2x!tpu.dma_semaphore, #tpu.memory_space<semaphore_mem>> -> memref<1x!tpu.dma_semaphore, #tpu.memory_space<semaphore_mem>>
    %81 = tpu.memref_squeeze %80 : memref<1x!tpu.dma_semaphore, #tpu.memory_space<semaphore_mem>> -> memref<!tpu.dma_semaphore, #tpu.memory_space<semaphore_mem>>
    tpu.enqueue_dma source(%77 : memref<16x16xbf16, #tpu.memory_space<any>>) target(%79 : memref<16x16xbf16, #tpu.memory_space<vmem>>) target_semaphore(%81 : memref<!tpu.dma_semaphore, #tpu.memory_space<semaphore_mem>>)
    %c0_63 = arith.constant 0 : index
    %c0_64 = arith.constant 0 : index
    %c0_65 = arith.constant 0 : index
    %82 = vector.load %arg16[%c0_63, %c0_64, %c0_65] : memref<2x16x16xbf16, #tpu.memory_space<vmem>>, vector<1x16x16xbf16>
    %83 = vector.shape_cast %82 : vector<1x16x16xbf16> to vector<16x16xbf16>
    %cst_66 = arith.constant dense<0.000000e+00> : vector<64x16xf32>
    %84 = tpu.matmul %24, %83, %cst_66 {dimension_numbers = #tpu.dot_dimension_numbers<[1], [0], [0], [1], [0, 0, 1, 1], [], []>} : vector<64x16xbf16>, vector<16x16xbf16>, vector<64x16xf32> -> vector<64x16xf32>
    %85 = vector.extract_strided_slice %11 {offsets = [0, 2], sizes = [1, 1], strides = [1, 1]} : vector<1x4xf32> to vector<1x1xf32>
    %86 = vector.broadcast %85 : vector<1x1xf32> to vector<64x16xf32>
    %87 = arith.mulf %84, %86 : vector<64x16xf32>
    %88 = arith.addf %69, %87 : vector<64x16xf32>
    %c0_i32_67 = arith.constant 0 : i32
    %c1_i32_68 = arith.constant 1 : i32
    %c1_i32_69 = arith.constant 1 : i32
    %c0_i32_70 = arith.constant 0 : i32
    %c0_i32_71 = arith.constant 0 : i32
    %89 = tpu.memref_slice %arg0[%c0_i32_67, %c0_i32_70, %c0_i32_71] : memref<4x16x16xbf16, #tpu.memory_space<any>> -> memref<1x16x16xbf16, #tpu.memory_space<any>>
    %90 = tpu.memref_squeeze %89 : memref<1x16x16xbf16, #tpu.memory_space<any>> -> memref<16x16xbf16, #tpu.memory_space<any>>
    %c0_i32_72 = arith.constant 0 : i32
    %c0_i32_73 = arith.constant 0 : i32
    %91 = tpu.memref_slice %arg16[%c1_i32_68, %c0_i32_72, %c0_i32_73] : memref<2x16x16xbf16, #tpu.memory_space<vmem>> -> memref<1x16x16xbf16, #tpu.memory_space<vmem>>
    %92 = tpu.memref_squeeze %91 : memref<1x16x16xbf16, #tpu.memory_space<vmem>> -> memref<16x16xbf16, #tpu.memory_space<vmem>>
    %93 = tpu.memref_slice %arg17[%c1_i32_69] : memref<2x!tpu.dma_semaphore, #tpu.memory_space<semaphore_mem>> -> memref<1x!tpu.dma_semaphore, #tpu.memory_space<semaphore_mem>>
    %94 = tpu.memref_squeeze %93 : memref<1x!tpu.dma_semaphore, #tpu.memory_space<semaphore_mem>> -> memref<!tpu.dma_semaphore, #tpu.memory_space<semaphore_mem>>
    tpu.wait_dma2 semaphore(%94 : memref<!tpu.dma_semaphore, #tpu.memory_space<semaphore_mem>>) src(%90 : memref<16x16xbf16, #tpu.memory_space<any>>) dst(%92 : memref<16x16xbf16, #tpu.memory_space<vmem>>)
    %c1_74 = arith.constant 1 : index
    %c0_75 = arith.constant 0 : index
    %c0_76 = arith.constant 0 : index
    %95 = vector.load %arg16[%c1_74, %c0_75, %c0_76] : memref<2x16x16xbf16, #tpu.memory_space<vmem>>, vector<1x16x16xbf16>
    %96 = vector.shape_cast %95 : vector<1x16x16xbf16> to vector<16x16xbf16>
    %cst_77 = arith.constant dense<0.000000e+00> : vector<64x16xf32>
    %97 = tpu.matmul %24, %96, %cst_77 {dimension_numbers = #tpu.dot_dimension_numbers<[1], [0], [0], [1], [0, 0, 1, 1], [], []>} : vector<64x16xbf16>, vector<16x16xbf16>, vector<64x16xf32> -> vector<64x16xf32>
    %98 = vector.extract_strided_slice %11 {offsets = [0, 3], sizes = [1, 1], strides = [1, 1]} : vector<1x4xf32> to vector<1x1xf32>
    %99 = vector.broadcast %98 : vector<1x1xf32> to vector<64x16xf32>
    %100 = arith.mulf %97, %99 : vector<64x16xf32>
    %101 = arith.addf %88, %100 : vector<64x16xf32>
    %102 = arith.truncf %101 : vector<64x16xf32> to vector<64x16xbf16>
    %c0_i32_78 = arith.constant 0 : i32
    %c0_i32_79 = arith.constant 0 : i32
    %c0_i32_80 = arith.constant 0 : i32
    %c0_i32_81 = arith.constant 0 : i32
    %c0_i32_82 = arith.constant 0 : i32
    %103 = tpu.memref_slice %arg0[%c0_i32_78, %c0_i32_81, %c0_i32_82] : memref<4x16x16xbf16, #tpu.memory_space<any>> -> memref<1x16x16xbf16, #tpu.memory_space<any>>
    %104 = tpu.memref_squeeze %103 : memref<1x16x16xbf16, #tpu.memory_space<any>> -> memref<16x16xbf16, #tpu.memory_space<any>>
    %c0_i32_83 = arith.constant 0 : i32
    %c0_i32_84 = arith.constant 0 : i32
    %105 = tpu.memref_slice %arg16[%c0_i32_79, %c0_i32_83, %c0_i32_84] : memref<2x16x16xbf16, #tpu.memory_space<vmem>> -> memref<1x16x16xbf16, #tpu.memory_space<vmem>>
    %106 = tpu.memref_squeeze %105 : memref<1x16x16xbf16, #tpu.memory_space<vmem>> -> memref<16x16xbf16, #tpu.memory_space<vmem>>
    %107 = tpu.memref_slice %arg17[%c0_i32_80] : memref<2x!tpu.dma_semaphore, #tpu.memory_space<semaphore_mem>> -> memref<1x!tpu.dma_semaphore, #tpu.memory_space<semaphore_mem>>
    %108 = tpu.memref_squeeze %107 : memref<1x!tpu.dma_semaphore, #tpu.memory_space<semaphore_mem>> -> memref<!tpu.dma_semaphore, #tpu.memory_space<semaphore_mem>>
    tpu.enqueue_dma source(%104 : memref<16x16xbf16, #tpu.memory_space<any>>) target(%106 : memref<16x16xbf16, #tpu.memory_space<vmem>>) target_semaphore(%108 : memref<!tpu.dma_semaphore, #tpu.memory_space<semaphore_mem>>)
    %cst_85 = arith.constant 0.000000e+00 : f32
    %109 = vector.broadcast %cst_85 : f32 to vector<64x16xf32>
    %c0_i32_86 = arith.constant 0 : i32
    %c0_i32_87 = arith.constant 0 : i32
    %c0_i32_88 = arith.constant 0 : i32
    %c0_i32_89 = arith.constant 0 : i32
    %c0_i32_90 = arith.constant 0 : i32
    %110 = tpu.memref_slice %arg0[%c0_i32_86, %c0_i32_89, %c0_i32_90] : memref<4x16x16xbf16, #tpu.memory_space<any>> -> memref<1x16x16xbf16, #tpu.memory_space<any>>
    %111 = tpu.memref_squeeze %110 : memref<1x16x16xbf16, #tpu.memory_space<any>> -> memref<16x16xbf16, #tpu.memory_space<any>>
    %c0_i32_91 = arith.constant 0 : i32
    %c0_i32_92 = arith.constant 0 : i32
    %112 = tpu.memref_slice %arg16[%c0_i32_87, %c0_i32_91, %c0_i32_92] : memref<2x16x16xbf16, #tpu.memory_space<vmem>> -> memref<1x16x16xbf16, #tpu.memory_space<vmem>>
    %113 = tpu.memref_squeeze %112 : memref<1x16x16xbf16, #tpu.memory_space<vmem>> -> memref<16x16xbf16, #tpu.memory_space<vmem>>
    %114 = tpu.memref_slice %arg17[%c0_i32_88] : memref<2x!tpu.dma_semaphore, #tpu.memory_space<semaphore_mem>> -> memref<1x!tpu.dma_semaphore, #tpu.memory_space<semaphore_mem>>
    %115 = tpu.memref_squeeze %114 : memref<1x!tpu.dma_semaphore, #tpu.memory_space<semaphore_mem>> -> memref<!tpu.dma_semaphore, #tpu.memory_space<semaphore_mem>>
    tpu.wait_dma2 semaphore(%115 : memref<!tpu.dma_semaphore, #tpu.memory_space<semaphore_mem>>) src(%111 : memref<16x16xbf16, #tpu.memory_space<any>>) dst(%113 : memref<16x16xbf16, #tpu.memory_space<vmem>>)
    %c1_i32_93 = arith.constant 1 : i32
    %c1_i32_94 = arith.constant 1 : i32
    %c1_i32_95 = arith.constant 1 : i32
    %c0_i32_96 = arith.constant 0 : i32
    %c0_i32_97 = arith.constant 0 : i32
    %116 = tpu.memref_slice %arg0[%c1_i32_93, %c0_i32_96, %c0_i32_97] : memref<4x16x16xbf16, #tpu.memory_space<any>> -> memref<1x16x16xbf16, #tpu.memory_space<any>>
    %117 = tpu.memref_squeeze %116 : memref<1x16x16xbf16, #tpu.memory_space<any>> -> memref<16x16xbf16, #tpu.memory_space<any>>
    %c0_i32_98 = arith.constant 0 : i32
    %c0_i32_99 = arith.constant 0 : i32
    %118 = tpu.memref_slice %arg16[%c1_i32_94, %c0_i32_98, %c0_i32_99] : memref<2x16x16xbf16, #tpu.memory_space<vmem>> -> memref<1x16x16xbf16, #tpu.memory_space<vmem>>
    %119 = tpu.memref_squeeze %118 : memref<1x16x16xbf16, #tpu.memory_space<vmem>> -> memref<16x16xbf16, #tpu.memory_space<vmem>>
    %120 = tpu.memref_slice %arg17[%c1_i32_95] : memref<2x!tpu.dma_semaphore, #tpu.memory_space<semaphore_mem>> -> memref<1x!tpu.dma_semaphore, #tpu.memory_space<semaphore_mem>>
    %121 = tpu.memref_squeeze %120 : memref<1x!tpu.dma_semaphore, #tpu.memory_space<semaphore_mem>> -> memref<!tpu.dma_semaphore, #tpu.memory_space<semaphore_mem>>
    tpu.enqueue_dma source(%117 : memref<16x16xbf16, #tpu.memory_space<any>>) target(%119 : memref<16x16xbf16, #tpu.memory_space<vmem>>) target_semaphore(%121 : memref<!tpu.dma_semaphore, #tpu.memory_space<semaphore_mem>>)
    %c0_100 = arith.constant 0 : index
    %c0_101 = arith.constant 0 : index
    %c0_102 = arith.constant 0 : index
    %122 = vector.load %arg16[%c0_100, %c0_101, %c0_102] : memref<2x16x16xbf16, #tpu.memory_space<vmem>>, vector<1x16x16xbf16>
    %123 = vector.shape_cast %122 : vector<1x16x16xbf16> to vector<16x16xbf16>
    %cst_103 = arith.constant dense<0.000000e+00> : vector<64x16xf32>
    %124 = tpu.matmul %102, %123, %cst_103 {dimension_numbers = #tpu.dot_dimension_numbers<[1], [0], [0], [1], [0, 0, 1, 1], [], []>} : vector<64x16xbf16>, vector<16x16xbf16>, vector<64x16xf32> -> vector<64x16xf32>
    %125 = vector.extract_strided_slice %23 {offsets = [0, 0], sizes = [1, 1], strides = [1, 1]} : vector<1x4xf32> to vector<1x1xf32>
    %126 = vector.broadcast %125 : vector<1x1xf32> to vector<64x16xf32>
    %127 = arith.mulf %124, %126 : vector<64x16xf32>
    %128 = arith.addf %109, %127 : vector<64x16xf32>
    %c0_i32_104 = arith.constant 0 : i32
    %c1_i32_105 = arith.constant 1 : i32
    %c1_i32_106 = arith.constant 1 : i32
    %c0_i32_107 = arith.constant 0 : i32
    %c0_i32_108 = arith.constant 0 : i32
    %129 = tpu.memref_slice %arg0[%c0_i32_104, %c0_i32_107, %c0_i32_108] : memref<4x16x16xbf16, #tpu.memory_space<any>> -> memref<1x16x16xbf16, #tpu.memory_space<any>>
    %130 = tpu.memref_squeeze %129 : memref<1x16x16xbf16, #tpu.memory_space<any>> -> memref<16x16xbf16, #tpu.memory_space<any>>
    %c0_i32_109 = arith.constant 0 : i32
    %c0_i32_110 = arith.constant 0 : i32
    %131 = tpu.memref_slice %arg16[%c1_i32_105, %c0_i32_109, %c0_i32_110] : memref<2x16x16xbf16, #tpu.memory_space<vmem>> -> memref<1x16x16xbf16, #tpu.memory_space<vmem>>
    %132 = tpu.memref_squeeze %131 : memref<1x16x16xbf16, #tpu.memory_space<vmem>> -> memref<16x16xbf16, #tpu.memory_space<vmem>>
    %133 = tpu.memref_slice %arg17[%c1_i32_106] : memref<2x!tpu.dma_semaphore, #tpu.memory_space<semaphore_mem>> -> memref<1x!tpu.dma_semaphore, #tpu.memory_space<semaphore_mem>>
    %134 = tpu.memref_squeeze %133 : memref<1x!tpu.dma_semaphore, #tpu.memory_space<semaphore_mem>> -> memref<!tpu.dma_semaphore, #tpu.memory_space<semaphore_mem>>
    tpu.wait_dma2 semaphore(%134 : memref<!tpu.dma_semaphore, #tpu.memory_space<semaphore_mem>>) src(%130 : memref<16x16xbf16, #tpu.memory_space<any>>) dst(%132 : memref<16x16xbf16, #tpu.memory_space<vmem>>)
    %c2_i32_111 = arith.constant 2 : i32
    %c0_i32_112 = arith.constant 0 : i32
    %c0_i32_113 = arith.constant 0 : i32
    %c0_i32_114 = arith.constant 0 : i32
    %c0_i32_115 = arith.constant 0 : i32
    %135 = tpu.memref_slice %arg0[%c2_i32_111, %c0_i32_114, %c0_i32_115] : memref<4x16x16xbf16, #tpu.memory_space<any>> -> memref<1x16x16xbf16, #tpu.memory_space<any>>
    %136 = tpu.memref_squeeze %135 : memref<1x16x16xbf16, #tpu.memory_space<any>> -> memref<16x16xbf16, #tpu.memory_space<any>>
    %c0_i32_116 = arith.constant 0 : i32
    %c0_i32_117 = arith.constant 0 : i32
    %137 = tpu.memref_slice %arg16[%c0_i32_112, %c0_i32_116, %c0_i32_117] : memref<2x16x16xbf16, #tpu.memory_space<vmem>> -> memref<1x16x16xbf16, #tpu.memory_space<vmem>>
    %138 = tpu.memref_squeeze %137 : memref<1x16x16xbf16, #tpu.memory_space<vmem>> -> memref<16x16xbf16, #tpu.memory_space<vmem>>
    %139 = tpu.memref_slice %arg17[%c0_i32_113] : memref<2x!tpu.dma_semaphore, #tpu.memory_space<semaphore_mem>> -> memref<1x!tpu.dma_semaphore, #tpu.memory_space<semaphore_mem>>
    %140 = tpu.memref_squeeze %139 : memref<1x!tpu.dma_semaphore, #tpu.memory_space<semaphore_mem>> -> memref<!tpu.dma_semaphore, #tpu.memory_space<semaphore_mem>>
    tpu.enqueue_dma source(%136 : memref<16x16xbf16, #tpu.memory_space<any>>) target(%138 : memref<16x16xbf16, #tpu.memory_space<vmem>>) target_semaphore(%140 : memref<!tpu.dma_semaphore, #tpu.memory_space<semaphore_mem>>)
    %c1_118 = arith.constant 1 : index
    %c0_119 = arith.constant 0 : index
    %c0_120 = arith.constant 0 : index
    %141 = vector.load %arg16[%c1_118, %c0_119, %c0_120] : memref<2x16x16xbf16, #tpu.memory_space<vmem>>, vector<1x16x16xbf16>
    %142 = vector.shape_cast %141 : vector<1x16x16xbf16> to vector<16x16xbf16>
    %cst_121 = arith.constant dense<0.000000e+00> : vector<64x16xf32>
    %143 = tpu.matmul %102, %142, %cst_121 {dimension_numbers = #tpu.dot_dimension_numbers<[1], [0], [0], [1], [0, 0, 1, 1], [], []>} : vector<64x16xbf16>, vector<16x16xbf16>, vector<64x16xf32> -> vector<64x16xf32>
    %144 = vector.extract_strided_slice %23 {offsets = [0, 1], sizes = [1, 1], strides = [1, 1]} : vector<1x4xf32> to vector<1x1xf32>
    %145 = vector.broadcast %144 : vector<1x1xf32> to vector<64x16xf32>
    %146 = arith.mulf %143, %145 : vector<64x16xf32>
    %147 = arith.addf %128, %146 : vector<64x16xf32>
    %c0_i32_122 = arith.constant 0 : i32
    %c0_i32_123 = arith.constant 0 : i32
    %c0_i32_124 = arith.constant 0 : i32
    %c0_i32_125 = arith.constant 0 : i32
    %c0_i32_126 = arith.constant 0 : i32
    %148 = tpu.memref_slice %arg0[%c0_i32_122, %c0_i32_125, %c0_i32_126] : memref<4x16x16xbf16, #tpu.memory_space<any>> -> memref<1x16x16xbf16, #tpu.memory_space<any>>
    %149 = tpu.memref_squeeze %148 : memref<1x16x16xbf16, #tpu.memory_space<any>> -> memref<16x16xbf16, #tpu.memory_space<any>>
    %c0_i32_127 = arith.constant 0 : i32
    %c0_i32_128 = arith.constant 0 : i32
    %150 = tpu.memref_slice %arg16[%c0_i32_123, %c0_i32_127, %c0_i32_128] : memref<2x16x16xbf16, #tpu.memory_space<vmem>> -> memref<1x16x16xbf16, #tpu.memory_space<vmem>>
    %151 = tpu.memref_squeeze %150 : memref<1x16x16xbf16, #tpu.memory_space<vmem>> -> memref<16x16xbf16, #tpu.memory_space<vmem>>
    %152 = tpu.memref_slice %arg17[%c0_i32_124] : memref<2x!tpu.dma_semaphore, #tpu.memory_space<semaphore_mem>> -> memref<1x!tpu.dma_semaphore, #tpu.memory_space<semaphore_mem>>
    %153 = tpu.memref_squeeze %152 : memref<1x!tpu.dma_semaphore, #tpu.memory_space<semaphore_mem>> -> memref<!tpu.dma_semaphore, #tpu.memory_space<semaphore_mem>>
    tpu.wait_dma2 semaphore(%153 : memref<!tpu.dma_semaphore, #tpu.memory_space<semaphore_mem>>) src(%149 : memref<16x16xbf16, #tpu.memory_space<any>>) dst(%151 : memref<16x16xbf16, #tpu.memory_space<vmem>>)
    %c3_i32_129 = arith.constant 3 : i32
    %c1_i32_130 = arith.constant 1 : i32
    %c1_i32_131 = arith.constant 1 : i32
    %c0_i32_132 = arith.constant 0 : i32
    %c0_i32_133 = arith.constant 0 : i32
    %154 = tpu.memref_slice %arg0[%c3_i32_129, %c0_i32_132, %c0_i32_133] : memref<4x16x16xbf16, #tpu.memory_space<any>> -> memref<1x16x16xbf16, #tpu.memory_space<any>>
    %155 = tpu.memref_squeeze %154 : memref<1x16x16xbf16, #tpu.memory_space<any>> -> memref<16x16xbf16, #tpu.memory_space<any>>
    %c0_i32_134 = arith.constant 0 : i32
    %c0_i32_135 = arith.constant 0 : i32
    %156 = tpu.memref_slice %arg16[%c1_i32_130, %c0_i32_134, %c0_i32_135] : memref<2x16x16xbf16, #tpu.memory_space<vmem>> -> memref<1x16x16xbf16, #tpu.memory_space<vmem>>
    %157 = tpu.memref_squeeze %156 : memref<1x16x16xbf16, #tpu.memory_space<vmem>> -> memref<16x16xbf16, #tpu.memory_space<vmem>>
    %158 = tpu.memref_slice %arg17[%c1_i32_131] : memref<2x!tpu.dma_semaphore, #tpu.memory_space<semaphore_mem>> -> memref<1x!tpu.dma_semaphore, #tpu.memory_space<semaphore_mem>>
    %159 = tpu.memref_squeeze %158 : memref<1x!tpu.dma_semaphore, #tpu.memory_space<semaphore_mem>> -> memref<!tpu.dma_semaphore, #tpu.memory_space<semaphore_mem>>
    tpu.enqueue_dma source(%155 : memref<16x16xbf16, #tpu.memory_space<any>>) target(%157 : memref<16x16xbf16, #tpu.memory_space<vmem>>) target_semaphore(%159 : memref<!tpu.dma_semaphore, #tpu.memory_space<semaphore_mem>>)
    %c0_136 = arith.constant 0 : index
    %c0_137 = arith.constant 0 : index
    %c0_138 = arith.constant 0 : index
    %160 = vector.load %arg16[%c0_136, %c0_137, %c0_138] : memref<2x16x16xbf16, #tpu.memory_space<vmem>>, vector<1x16x16xbf16>
    %161 = vector.shape_cast %160 : vector<1x16x16xbf16> to vector<16x16xbf16>
    %cst_139 = arith.constant dense<0.000000e+00> : vector<64x16xf32>
    %162 = tpu.matmul %102, %161, %cst_139 {dimension_numbers = #tpu.dot_dimension_numbers<[1], [0], [0], [1], [0, 0, 1, 1], [], []>} : vector<64x16xbf16>, vector<16x16xbf16>, vector<64x16xf32> -> vector<64x16xf32>
    %163 = vector.extract_strided_slice %23 {offsets = [0, 2], sizes = [1, 1], strides = [1, 1]} : vector<1x4xf32> to vector<1x1xf32>
    %164 = vector.broadcast %163 : vector<1x1xf32> to vector<64x16xf32>
    %165 = arith.mulf %162, %164 : vector<64x16xf32>
    %166 = arith.addf %147, %165 : vector<64x16xf32>
    %c0_i32_140 = arith.constant 0 : i32
    %c1_i32_141 = arith.constant 1 : i32
    %c1_i32_142 = arith.constant 1 : i32
    %c0_i32_143 = arith.constant 0 : i32
    %c0_i32_144 = arith.constant 0 : i32
    %167 = tpu.memref_slice %arg0[%c0_i32_140, %c0_i32_143, %c0_i32_144] : memref<4x16x16xbf16, #tpu.memory_space<any>> -> memref<1x16x16xbf16, #tpu.memory_space<any>>
    %168 = tpu.memref_squeeze %167 : memref<1x16x16xbf16, #tpu.memory_space<any>> -> memref<16x16xbf16, #tpu.memory_space<any>>
    %c0_i32_145 = arith.constant 0 : i32
    %c0_i32_146 = arith.constant 0 : i32
    %169 = tpu.memref_slice %arg16[%c1_i32_141, %c0_i32_145, %c0_i32_146] : memref<2x16x16xbf16, #tpu.memory_space<vmem>> -> memref<1x16x16xbf16, #tpu.memory_space<vmem>>
    %170 = tpu.memref_squeeze %169 : memref<1x16x16xbf16, #tpu.memory_space<vmem>> -> memref<16x16xbf16, #tpu.memory_space<vmem>>
    %171 = tpu.memref_slice %arg17[%c1_i32_142] : memref<2x!tpu.dma_semaphore, #tpu.memory_space<semaphore_mem>> -> memref<1x!tpu.dma_semaphore, #tpu.memory_space<semaphore_mem>>
    %172 = tpu.memref_squeeze %171 : memref<1x!tpu.dma_semaphore, #tpu.memory_space<semaphore_mem>> -> memref<!tpu.dma_semaphore, #tpu.memory_space<semaphore_mem>>
    tpu.wait_dma2 semaphore(%172 : memref<!tpu.dma_semaphore, #tpu.memory_space<semaphore_mem>>) src(%168 : memref<16x16xbf16, #tpu.memory_space<any>>) dst(%170 : memref<16x16xbf16, #tpu.memory_space<vmem>>)
    %c1_147 = arith.constant 1 : index
    %c0_148 = arith.constant 0 : index
    %c0_149 = arith.constant 0 : index
    %173 = vector.load %arg16[%c1_147, %c0_148, %c0_149] : memref<2x16x16xbf16, #tpu.memory_space<vmem>>, vector<1x16x16xbf16>
    %174 = vector.shape_cast %173 : vector<1x16x16xbf16> to vector<16x16xbf16>
    %cst_150 = arith.constant dense<0.000000e+00> : vector<64x16xf32>
    %175 = tpu.matmul %102, %174, %cst_150 {dimension_numbers = #tpu.dot_dimension_numbers<[1], [0], [0], [1], [0, 0, 1, 1], [], []>} : vector<64x16xbf16>, vector<16x16xbf16>, vector<64x16xf32> -> vector<64x16xf32>
    %176 = vector.extract_strided_slice %23 {offsets = [0, 3], sizes = [1, 1], strides = [1, 1]} : vector<1x4xf32> to vector<1x1xf32>
    %177 = vector.broadcast %176 : vector<1x1xf32> to vector<64x16xf32>
    %178 = arith.mulf %175, %177 : vector<64x16xf32>
    %179 = arith.addf %166, %178 : vector<64x16xf32>
    %c0_151 = arith.constant 0 : index
    %c0_152 = arith.constant 0 : index
    %180 = vector.load %arg4[%c0_151, %c0_152] : memref<1x16xf32, #tpu.memory_space<vmem>>, vector<1x16xf32>
    %cst_153 = arith.constant 0.000000e+00 : f32
    %181 = vector.broadcast %cst_153 : f32 to vector<1x16xf32>
    %182 = arith.maximumf %180, %181 : vector<1x16xf32>
    %c0_154 = arith.constant 0 : index
    %c0_155 = arith.constant 0 : index
    %183 = memref.load %arg5[%c0_154, %c0_155] : memref<1x1xf32, #tpu.memory_space<smem>>
    %184 = arith.extf %24 : vector<64x16xbf16> to vector<64x16xf32>
    %185 = vector.broadcast %182 : vector<1x16xf32> to vector<64x16xf32>
    %186 = arith.mulf %184, %185 : vector<64x16xf32>
    %187 = vector.broadcast %183 : f32 to vector<64x16xf32>
    %188 = arith.subf %179, %187 : vector<64x16xf32>
    %cst_156 = arith.constant 0.000000e+00 : f32
    %189 = vector.broadcast %cst_156 : f32 to vector<64x16xf32>
    %190 = arith.maximumf %188, %189 : vector<64x16xf32>
    %191 = arith.addf %186, %190 : vector<64x16xf32>
    %192 = arith.truncf %191 : vector<64x16xf32> to vector<64x16xbf16>
    %c0_157 = arith.constant 0 : index
    %c0_158 = arith.constant 0 : index
    %193 = vector.load %arg6[%c0_157, %c0_158] : memref<16x32xbf16, #tpu.memory_space<vmem>>, vector<16x32xbf16>
    %cst_159 = arith.constant dense<0.000000e+00> : vector<64x32xf32>
    %194 = tpu.matmul %192, %193, %cst_159 {dimension_numbers = #tpu.dot_dimension_numbers<[1], [0], [0], [1], [0, 0, 1, 1], [], []>} : vector<64x16xbf16>, vector<16x32xbf16>, vector<64x32xf32> -> vector<64x32xf32>
    %c0_160 = arith.constant 0 : index
    %c0_161 = arith.constant 0 : index
    %195 = vector.load %arg7[%c0_160, %c0_161] : memref<1x32xf32, #tpu.memory_space<vmem>>, vector<1x32xf32>
    %196 = vector.broadcast %195 : vector<1x32xf32> to vector<64x32xf32>
    %197 = arith.addf %194, %196 : vector<64x32xf32>
    %cst_162 = arith.constant 0.000000e+00 : f32
    %198 = vector.broadcast %cst_162 : f32 to vector<64x32xf32>
    %199 = arith.maximumf %197, %198 : vector<64x32xf32>
    %200 = arith.truncf %199 : vector<64x32xf32> to vector<64x32xbf16>
    %c0_163 = arith.constant 0 : index
    %c0_164 = arith.constant 0 : index
    %201 = vector.load %arg8[%c0_163, %c0_164] : memref<32x128xbf16, #tpu.memory_space<vmem>>, vector<32x128xbf16>
    %cst_165 = arith.constant dense<0.000000e+00> : vector<64x128xf32>
    %202 = tpu.matmul %200, %201, %cst_165 {dimension_numbers = #tpu.dot_dimension_numbers<[1], [0], [0], [1], [0, 0, 1, 1], [], []>} : vector<64x32xbf16>, vector<32x128xbf16>, vector<64x128xf32> -> vector<64x128xf32>
    %c0_166 = arith.constant 0 : index
    %c0_167 = arith.constant 0 : index
    %203 = vector.load %arg10[%c0_166, %c0_167] : memref<1x128xf32, #tpu.memory_space<vmem>>, vector<1x128xf32>
    %204 = vector.broadcast %203 : vector<1x128xf32> to vector<64x128xf32>
    %205 = arith.addf %202, %204 : vector<64x128xf32>
    %c0_168 = arith.constant 0 : index
    %c0_169 = arith.constant 0 : index
    %206 = vector.load %arg9[%c0_168, %c0_169] : memref<32x128xbf16, #tpu.memory_space<vmem>>, vector<32x128xbf16>
    %c0_170 = arith.constant 0 : index
    %c0_171 = arith.constant 0 : index
    %207 = vector.load %arg11[%c0_170, %c0_171] : memref<8x32xf32, #tpu.memory_space<vmem>>, vector<8x32xf32>
    %c0_172 = arith.constant 0 : index
    %c0_173 = arith.constant 0 : index
    %208 = vector.load %arg12[%c0_172, %c0_173] : memref<8x32xf32, #tpu.memory_space<vmem>>, vector<8x32xf32>
    %c0_174 = arith.constant 0 : index
    %c0_175 = arith.constant 0 : index
    %209 = vector.load %arg13[%c0_174, %c0_175] : memref<8x1xi32, #tpu.memory_space<vmem>>, vector<8x1xi32>
    %210 = vector.extract_strided_slice %205 {offsets = [0, 0], sizes = [8, 128], strides = [1, 1]} : vector<64x128xf32> to vector<8x128xf32>
    %211 = arith.truncf %207 : vector<8x32xf32> to vector<8x32xbf16>
    %cst_176 = arith.constant dense<0.000000e+00> : vector<8x128xf32>
    %212 = tpu.matmul %211, %206, %cst_176 {dimension_numbers = #tpu.dot_dimension_numbers<[1], [0], [0], [1], [0, 0, 1, 1], [], []>} : vector<8x32xbf16>, vector<32x128xbf16>, vector<8x128xf32> -> vector<8x128xf32>
    %213 = arith.addf %210, %212 : vector<8x128xf32>
    %214 = vector.extract_strided_slice %213 {offsets = [0, 0], sizes = [8, 32], strides = [1, 1]} : vector<8x128xf32> to vector<8x32xf32>
    %215 = arith.negf %214 : vector<8x32xf32>
    %216 = math.exp %215 : vector<8x32xf32>
    %cst_177 = arith.constant 1.000000e+00 : f32
    %217 = vector.broadcast %cst_177 : f32 to vector<8x32xf32>
    %218 = arith.addf %217, %216 : vector<8x32xf32>
    %219 = arith.divf %217, %218 : vector<8x32xf32>
    %220 = vector.extract_strided_slice %213 {offsets = [0, 32], sizes = [8, 32], strides = [1, 1]} : vector<8x128xf32> to vector<8x32xf32>
    %221 = arith.negf %220 : vector<8x32xf32>
    %222 = math.exp %221 : vector<8x32xf32>
    %cst_178 = arith.constant 1.000000e+00 : f32
    %223 = vector.broadcast %cst_178 : f32 to vector<8x32xf32>
    %224 = arith.addf %223, %222 : vector<8x32xf32>
    %225 = arith.divf %223, %224 : vector<8x32xf32>
    %226 = vector.extract_strided_slice %213 {offsets = [0, 64], sizes = [8, 32], strides = [1, 1]} : vector<8x128xf32> to vector<8x32xf32>
    %227 = math.tanh %226 : vector<8x32xf32>
    %228 = vector.extract_strided_slice %213 {offsets = [0, 96], sizes = [8, 32], strides = [1, 1]} : vector<8x128xf32> to vector<8x32xf32>
    %229 = arith.negf %228 : vector<8x32xf32>
    %230 = math.exp %229 : vector<8x32xf32>
    %cst_179 = arith.constant 1.000000e+00 : f32
    %231 = vector.broadcast %cst_179 : f32 to vector<8x32xf32>
    %232 = arith.addf %231, %230 : vector<8x32xf32>
    %233 = arith.divf %231, %232 : vector<8x32xf32>
    %234 = arith.mulf %225, %208 : vector<8x32xf32>
    %235 = arith.mulf %219, %227 : vector<8x32xf32>
    %236 = arith.addf %234, %235 : vector<8x32xf32>
    %237 = math.tanh %236 : vector<8x32xf32>
    %238 = arith.mulf %233, %237 : vector<8x32xf32>
    %c1_i32_180 = arith.constant 1 : i32
    %239 = vector.broadcast %c1_i32_180 : i32 to vector<8x1xi32>
    %240 = arith.cmpi eq, %209, %239 : vector<8x1xi32>
    %241 = vector.shape_cast %240 : vector<8x1xi1> to vector<8x1xi1>
    %242 = vector.broadcast %241 : vector<8x1xi1> to vector<8x32xi1>
    %243 = arith.select %242, %238, %207 : vector<8x32xi1>, vector<8x32xf32>
    %244 = vector.extract_strided_slice %205 {offsets = [8, 0], sizes = [8, 128], strides = [1, 1]} : vector<64x128xf32> to vector<8x128xf32>
    %245 = arith.truncf %238 : vector<8x32xf32> to vector<8x32xbf16>
    %cst_181 = arith.constant dense<0.000000e+00> : vector<8x128xf32>
    %246 = tpu.matmul %245, %206, %cst_181 {dimension_numbers = #tpu.dot_dimension_numbers<[1], [0], [0], [1], [0, 0, 1, 1], [], []>} : vector<8x32xbf16>, vector<32x128xbf16>, vector<8x128xf32> -> vector<8x128xf32>
    %247 = arith.addf %244, %246 : vector<8x128xf32>
    %248 = vector.extract_strided_slice %247 {offsets = [0, 0], sizes = [8, 32], strides = [1, 1]} : vector<8x128xf32> to vector<8x32xf32>
    %249 = arith.negf %248 : vector<8x32xf32>
    %250 = math.exp %249 : vector<8x32xf32>
    %cst_182 = arith.constant 1.000000e+00 : f32
    %251 = vector.broadcast %cst_182 : f32 to vector<8x32xf32>
    %252 = arith.addf %251, %250 : vector<8x32xf32>
    %253 = arith.divf %251, %252 : vector<8x32xf32>
    %254 = vector.extract_strided_slice %247 {offsets = [0, 32], sizes = [8, 32], strides = [1, 1]} : vector<8x128xf32> to vector<8x32xf32>
    %255 = arith.negf %254 : vector<8x32xf32>
    %256 = math.exp %255 : vector<8x32xf32>
    %cst_183 = arith.constant 1.000000e+00 : f32
    %257 = vector.broadcast %cst_183 : f32 to vector<8x32xf32>
    %258 = arith.addf %257, %256 : vector<8x32xf32>
    %259 = arith.divf %257, %258 : vector<8x32xf32>
    %260 = vector.extract_strided_slice %247 {offsets = [0, 64], sizes = [8, 32], strides = [1, 1]} : vector<8x128xf32> to vector<8x32xf32>
    %261 = math.tanh %260 : vector<8x32xf32>
    %262 = vector.extract_strided_slice %247 {offsets = [0, 96], sizes = [8, 32], strides = [1, 1]} : vector<8x128xf32> to vector<8x32xf32>
    %263 = arith.negf %262 : vector<8x32xf32>
    %264 = math.exp %263 : vector<8x32xf32>
    %cst_184 = arith.constant 1.000000e+00 : f32
    %265 = vector.broadcast %cst_184 : f32 to vector<8x32xf32>
    %266 = arith.addf %265, %264 : vector<8x32xf32>
    %267 = arith.divf %265, %266 : vector<8x32xf32>
    %268 = arith.mulf %259, %236 : vector<8x32xf32>
    %269 = arith.mulf %253, %261 : vector<8x32xf32>
    %270 = arith.addf %268, %269 : vector<8x32xf32>
    %271 = math.tanh %270 : vector<8x32xf32>
    %272 = arith.mulf %267, %271 : vector<8x32xf32>
    %c2_i32_185 = arith.constant 2 : i32
    %273 = vector.broadcast %c2_i32_185 : i32 to vector<8x1xi32>
    %274 = arith.cmpi eq, %209, %273 : vector<8x1xi32>
    %275 = vector.shape_cast %274 : vector<8x1xi1> to vector<8x1xi1>
    %276 = vector.broadcast %275 : vector<8x1xi1> to vector<8x32xi1>
    %277 = arith.select %276, %272, %243 : vector<8x32xi1>, vector<8x32xf32>
    %278 = vector.extract_strided_slice %205 {offsets = [16, 0], sizes = [8, 128], strides = [1, 1]} : vector<64x128xf32> to vector<8x128xf32>
    %279 = arith.truncf %272 : vector<8x32xf32> to vector<8x32xbf16>
    %cst_186 = arith.constant dense<0.000000e+00> : vector<8x128xf32>
    %280 = tpu.matmul %279, %206, %cst_186 {dimension_numbers = #tpu.dot_dimension_numbers<[1], [0], [0], [1], [0, 0, 1, 1], [], []>} : vector<8x32xbf16>, vector<32x128xbf16>, vector<8x128xf32> -> vector<8x128xf32>
    %281 = arith.addf %278, %280 : vector<8x128xf32>
    %282 = vector.extract_strided_slice %281 {offsets = [0, 0], sizes = [8, 32], strides = [1, 1]} : vector<8x128xf32> to vector<8x32xf32>
    %283 = arith.negf %282 : vector<8x32xf32>
    %284 = math.exp %283 : vector<8x32xf32>
    %cst_187 = arith.constant 1.000000e+00 : f32
    %285 = vector.broadcast %cst_187 : f32 to vector<8x32xf32>
    %286 = arith.addf %285, %284 : vector<8x32xf32>
    %287 = arith.divf %285, %286 : vector<8x32xf32>
    %288 = vector.extract_strided_slice %281 {offsets = [0, 32], sizes = [8, 32], strides = [1, 1]} : vector<8x128xf32> to vector<8x32xf32>
    %289 = arith.negf %288 : vector<8x32xf32>
    %290 = math.exp %289 : vector<8x32xf32>
    %cst_188 = arith.constant 1.000000e+00 : f32
    %291 = vector.broadcast %cst_188 : f32 to vector<8x32xf32>
    %292 = arith.addf %291, %290 : vector<8x32xf32>
    %293 = arith.divf %291, %292 : vector<8x32xf32>
    %294 = vector.extract_strided_slice %281 {offsets = [0, 64], sizes = [8, 32], strides = [1, 1]} : vector<8x128xf32> to vector<8x32xf32>
    %295 = math.tanh %294 : vector<8x32xf32>
    %296 = vector.extract_strided_slice %281 {offsets = [0, 96], sizes = [8, 32], strides = [1, 1]} : vector<8x128xf32> to vector<8x32xf32>
    %297 = arith.negf %296 : vector<8x32xf32>
    %298 = math.exp %297 : vector<8x32xf32>
    %cst_189 = arith.constant 1.000000e+00 : f32
    %299 = vector.broadcast %cst_189 : f32 to vector<8x32xf32>
    %300 = arith.addf %299, %298 : vector<8x32xf32>
    %301 = arith.divf %299, %300 : vector<8x32xf32>
    %302 = arith.mulf %293, %270 : vector<8x32xf32>
    %303 = arith.mulf %287, %295 : vector<8x32xf32>
    %304 = arith.addf %302, %303 : vector<8x32xf32>
    %305 = math.tanh %304 : vector<8x32xf32>
    %306 = arith.mulf %301, %305 : vector<8x32xf32>
    %c3_i32_190 = arith.constant 3 : i32
    %307 = vector.broadcast %c3_i32_190 : i32 to vector<8x1xi32>
    %308 = arith.cmpi eq, %209, %307 : vector<8x1xi32>
    %309 = vector.shape_cast %308 : vector<8x1xi1> to vector<8x1xi1>
    %310 = vector.broadcast %309 : vector<8x1xi1> to vector<8x32xi1>
    %311 = arith.select %310, %306, %277 : vector<8x32xi1>, vector<8x32xf32>
    %312 = vector.extract_strided_slice %205 {offsets = [24, 0], sizes = [8, 128], strides = [1, 1]} : vector<64x128xf32> to vector<8x128xf32>
    %313 = arith.truncf %306 : vector<8x32xf32> to vector<8x32xbf16>
    %cst_191 = arith.constant dense<0.000000e+00> : vector<8x128xf32>
    %314 = tpu.matmul %313, %206, %cst_191 {dimension_numbers = #tpu.dot_dimension_numbers<[1], [0], [0], [1], [0, 0, 1, 1], [], []>} : vector<8x32xbf16>, vector<32x128xbf16>, vector<8x128xf32> -> vector<8x128xf32>
    %315 = arith.addf %312, %314 : vector<8x128xf32>
    %316 = vector.extract_strided_slice %315 {offsets = [0, 0], sizes = [8, 32], strides = [1, 1]} : vector<8x128xf32> to vector<8x32xf32>
    %317 = arith.negf %316 : vector<8x32xf32>
    %318 = math.exp %317 : vector<8x32xf32>
    %cst_192 = arith.constant 1.000000e+00 : f32
    %319 = vector.broadcast %cst_192 : f32 to vector<8x32xf32>
    %320 = arith.addf %319, %318 : vector<8x32xf32>
    %321 = arith.divf %319, %320 : vector<8x32xf32>
    %322 = vector.extract_strided_slice %315 {offsets = [0, 32], sizes = [8, 32], strides = [1, 1]} : vector<8x128xf32> to vector<8x32xf32>
    %323 = arith.negf %322 : vector<8x32xf32>
    %324 = math.exp %323 : vector<8x32xf32>
    %cst_193 = arith.constant 1.000000e+00 : f32
    %325 = vector.broadcast %cst_193 : f32 to vector<8x32xf32>
    %326 = arith.addf %325, %324 : vector<8x32xf32>
    %327 = arith.divf %325, %326 : vector<8x32xf32>
    %328 = vector.extract_strided_slice %315 {offsets = [0, 64], sizes = [8, 32], strides = [1, 1]} : vector<8x128xf32> to vector<8x32xf32>
    %329 = math.tanh %328 : vector<8x32xf32>
    %330 = vector.extract_strided_slice %315 {offsets = [0, 96], sizes = [8, 32], strides = [1, 1]} : vector<8x128xf32> to vector<8x32xf32>
    %331 = arith.negf %330 : vector<8x32xf32>
    %332 = math.exp %331 : vector<8x32xf32>
    %cst_194 = arith.constant 1.000000e+00 : f32
    %333 = vector.broadcast %cst_194 : f32 to vector<8x32xf32>
    %334 = arith.addf %333, %332 : vector<8x32xf32>
    %335 = arith.divf %333, %334 : vector<8x32xf32>
    %336 = arith.mulf %327, %304 : vector<8x32xf32>
    %337 = arith.mulf %321, %329 : vector<8x32xf32>
    %338 = arith.addf %336, %337 : vector<8x32xf32>
    %339 = math.tanh %338 : vector<8x32xf32>
    %340 = arith.mulf %335, %339 : vector<8x32xf32>
    %c4_i32 = arith.constant 4 : i32
    %341 = vector.broadcast %c4_i32 : i32 to vector<8x1xi32>
    %342 = arith.cmpi eq, %209, %341 : vector<8x1xi32>
    %343 = vector.shape_cast %342 : vector<8x1xi1> to vector<8x1xi1>
    %344 = vector.broadcast %343 : vector<8x1xi1> to vector<8x32xi1>
    %345 = arith.select %344, %340, %311 : vector<8x32xi1>, vector<8x32xf32>
    %346 = vector.extract_strided_slice %205 {offsets = [32, 0], sizes = [8, 128], strides = [1, 1]} : vector<64x128xf32> to vector<8x128xf32>
    %347 = arith.truncf %340 : vector<8x32xf32> to vector<8x32xbf16>
    %cst_195 = arith.constant dense<0.000000e+00> : vector<8x128xf32>
    %348 = tpu.matmul %347, %206, %cst_195 {dimension_numbers = #tpu.dot_dimension_numbers<[1], [0], [0], [1], [0, 0, 1, 1], [], []>} : vector<8x32xbf16>, vector<32x128xbf16>, vector<8x128xf32> -> vector<8x128xf32>
    %349 = arith.addf %346, %348 : vector<8x128xf32>
    %350 = vector.extract_strided_slice %349 {offsets = [0, 0], sizes = [8, 32], strides = [1, 1]} : vector<8x128xf32> to vector<8x32xf32>
    %351 = arith.negf %350 : vector<8x32xf32>
    %352 = math.exp %351 : vector<8x32xf32>
    %cst_196 = arith.constant 1.000000e+00 : f32
    %353 = vector.broadcast %cst_196 : f32 to vector<8x32xf32>
    %354 = arith.addf %353, %352 : vector<8x32xf32>
    %355 = arith.divf %353, %354 : vector<8x32xf32>
    %356 = vector.extract_strided_slice %349 {offsets = [0, 32], sizes = [8, 32], strides = [1, 1]} : vector<8x128xf32> to vector<8x32xf32>
    %357 = arith.negf %356 : vector<8x32xf32>
    %358 = math.exp %357 : vector<8x32xf32>
    %cst_197 = arith.constant 1.000000e+00 : f32
    %359 = vector.broadcast %cst_197 : f32 to vector<8x32xf32>
    %360 = arith.addf %359, %358 : vector<8x32xf32>
    %361 = arith.divf %359, %360 : vector<8x32xf32>
    %362 = vector.extract_strided_slice %349 {offsets = [0, 64], sizes = [8, 32], strides = [1, 1]} : vector<8x128xf32> to vector<8x32xf32>
    %363 = math.tanh %362 : vector<8x32xf32>
    %364 = vector.extract_strided_slice %349 {offsets = [0, 96], sizes = [8, 32], strides = [1, 1]} : vector<8x128xf32> to vector<8x32xf32>
    %365 = arith.negf %364 : vector<8x32xf32>
    %366 = math.exp %365 : vector<8x32xf32>
    %cst_198 = arith.constant 1.000000e+00 : f32
    %367 = vector.broadcast %cst_198 : f32 to vector<8x32xf32>
    %368 = arith.addf %367, %366 : vector<8x32xf32>
    %369 = arith.divf %367, %368 : vector<8x32xf32>
    %370 = arith.mulf %361, %338 : vector<8x32xf32>
    %371 = arith.mulf %355, %363 : vector<8x32xf32>
    %372 = arith.addf %370, %371 : vector<8x32xf32>
    %373 = math.tanh %372 : vector<8x32xf32>
    %374 = arith.mulf %369, %373 : vector<8x32xf32>
    %c5_i32 = arith.constant 5 : i32
    %375 = vector.broadcast %c5_i32 : i32 to vector<8x1xi32>
    %376 = arith.cmpi eq, %209, %375 : vector<8x1xi32>
    %377 = vector.shape_cast %376 : vector<8x1xi1> to vector<8x1xi1>
    %378 = vector.broadcast %377 : vector<8x1xi1> to vector<8x32xi1>
    %379 = arith.select %378, %374, %345 : vector<8x32xi1>, vector<8x32xf32>
    %380 = vector.extract_strided_slice %205 {offsets = [40, 0], sizes = [8, 128], strides = [1, 1]} : vector<64x128xf32> to vector<8x128xf32>
    %381 = arith.truncf %374 : vector<8x32xf32> to vector<8x32xbf16>
    %cst_199 = arith.constant dense<0.000000e+00> : vector<8x128xf32>
    %382 = tpu.matmul %381, %206, %cst_199 {dimension_numbers = #tpu.dot_dimension_numbers<[1], [0], [0], [1], [0, 0, 1, 1], [], []>} : vector<8x32xbf16>, vector<32x128xbf16>, vector<8x128xf32> -> vector<8x128xf32>
    %383 = arith.addf %380, %382 : vector<8x128xf32>
    %384 = vector.extract_strided_slice %383 {offsets = [0, 0], sizes = [8, 32], strides = [1, 1]} : vector<8x128xf32> to vector<8x32xf32>
    %385 = arith.negf %384 : vector<8x32xf32>
    %386 = math.exp %385 : vector<8x32xf32>
    %cst_200 = arith.constant 1.000000e+00 : f32
    %387 = vector.broadcast %cst_200 : f32 to vector<8x32xf32>
    %388 = arith.addf %387, %386 : vector<8x32xf32>
    %389 = arith.divf %387, %388 : vector<8x32xf32>
    %390 = vector.extract_strided_slice %383 {offsets = [0, 32], sizes = [8, 32], strides = [1, 1]} : vector<8x128xf32> to vector<8x32xf32>
    %391 = arith.negf %390 : vector<8x32xf32>
    %392 = math.exp %391 : vector<8x32xf32>
    %cst_201 = arith.constant 1.000000e+00 : f32
    %393 = vector.broadcast %cst_201 : f32 to vector<8x32xf32>
    %394 = arith.addf %393, %392 : vector<8x32xf32>
    %395 = arith.divf %393, %394 : vector<8x32xf32>
    %396 = vector.extract_strided_slice %383 {offsets = [0, 64], sizes = [8, 32], strides = [1, 1]} : vector<8x128xf32> to vector<8x32xf32>
    %397 = math.tanh %396 : vector<8x32xf32>
    %398 = vector.extract_strided_slice %383 {offsets = [0, 96], sizes = [8, 32], strides = [1, 1]} : vector<8x128xf32> to vector<8x32xf32>
    %399 = arith.negf %398 : vector<8x32xf32>
    %400 = math.exp %399 : vector<8x32xf32>
    %cst_202 = arith.constant 1.000000e+00 : f32
    %401 = vector.broadcast %cst_202 : f32 to vector<8x32xf32>
    %402 = arith.addf %401, %400 : vector<8x32xf32>
    %403 = arith.divf %401, %402 : vector<8x32xf32>
    %404 = arith.mulf %395, %372 : vector<8x32xf32>
    %405 = arith.mulf %389, %397 : vector<8x32xf32>
    %406 = arith.addf %404, %405 : vector<8x32xf32>
    %407 = math.tanh %406 : vector<8x32xf32>
    %408 = arith.mulf %403, %407 : vector<8x32xf32>
    %c6_i32 = arith.constant 6 : i32
    %409 = vector.broadcast %c6_i32 : i32 to vector<8x1xi32>
    %410 = arith.cmpi eq, %209, %409 : vector<8x1xi32>
    %411 = vector.shape_cast %410 : vector<8x1xi1> to vector<8x1xi1>
    %412 = vector.broadcast %411 : vector<8x1xi1> to vector<8x32xi1>
    %413 = arith.select %412, %408, %379 : vector<8x32xi1>, vector<8x32xf32>
    %414 = vector.extract_strided_slice %205 {offsets = [48, 0], sizes = [8, 128], strides = [1, 1]} : vector<64x128xf32> to vector<8x128xf32>
    %415 = arith.truncf %408 : vector<8x32xf32> to vector<8x32xbf16>
    %cst_203 = arith.constant dense<0.000000e+00> : vector<8x128xf32>
    %416 = tpu.matmul %415, %206, %cst_203 {dimension_numbers = #tpu.dot_dimension_numbers<[1], [0], [0], [1], [0, 0, 1, 1], [], []>} : vector<8x32xbf16>, vector<32x128xbf16>, vector<8x128xf32> -> vector<8x128xf32>
    %417 = arith.addf %414, %416 : vector<8x128xf32>
    %418 = vector.extract_strided_slice %417 {offsets = [0, 0], sizes = [8, 32], strides = [1, 1]} : vector<8x128xf32> to vector<8x32xf32>
    %419 = arith.negf %418 : vector<8x32xf32>
    %420 = math.exp %419 : vector<8x32xf32>
    %cst_204 = arith.constant 1.000000e+00 : f32
    %421 = vector.broadcast %cst_204 : f32 to vector<8x32xf32>
    %422 = arith.addf %421, %420 : vector<8x32xf32>
    %423 = arith.divf %421, %422 : vector<8x32xf32>
    %424 = vector.extract_strided_slice %417 {offsets = [0, 32], sizes = [8, 32], strides = [1, 1]} : vector<8x128xf32> to vector<8x32xf32>
    %425 = arith.negf %424 : vector<8x32xf32>
    %426 = math.exp %425 : vector<8x32xf32>
    %cst_205 = arith.constant 1.000000e+00 : f32
    %427 = vector.broadcast %cst_205 : f32 to vector<8x32xf32>
    %428 = arith.addf %427, %426 : vector<8x32xf32>
    %429 = arith.divf %427, %428 : vector<8x32xf32>
    %430 = vector.extract_strided_slice %417 {offsets = [0, 64], sizes = [8, 32], strides = [1, 1]} : vector<8x128xf32> to vector<8x32xf32>
    %431 = math.tanh %430 : vector<8x32xf32>
    %432 = vector.extract_strided_slice %417 {offsets = [0, 96], sizes = [8, 32], strides = [1, 1]} : vector<8x128xf32> to vector<8x32xf32>
    %433 = arith.negf %432 : vector<8x32xf32>
    %434 = math.exp %433 : vector<8x32xf32>
    %cst_206 = arith.constant 1.000000e+00 : f32
    %435 = vector.broadcast %cst_206 : f32 to vector<8x32xf32>
    %436 = arith.addf %435, %434 : vector<8x32xf32>
    %437 = arith.divf %435, %436 : vector<8x32xf32>
    %438 = arith.mulf %429, %406 : vector<8x32xf32>
    %439 = arith.mulf %423, %431 : vector<8x32xf32>
    %440 = arith.addf %438, %439 : vector<8x32xf32>
    %441 = math.tanh %440 : vector<8x32xf32>
    %442 = arith.mulf %437, %441 : vector<8x32xf32>
    %c7_i32 = arith.constant 7 : i32
    %443 = vector.broadcast %c7_i32 : i32 to vector<8x1xi32>
    %444 = arith.cmpi eq, %209, %443 : vector<8x1xi32>
    %445 = vector.shape_cast %444 : vector<8x1xi1> to vector<8x1xi1>
    %446 = vector.broadcast %445 : vector<8x1xi1> to vector<8x32xi1>
    %447 = arith.select %446, %442, %413 : vector<8x32xi1>, vector<8x32xf32>
    %448 = vector.extract_strided_slice %205 {offsets = [56, 0], sizes = [8, 128], strides = [1, 1]} : vector<64x128xf32> to vector<8x128xf32>
    %449 = arith.truncf %442 : vector<8x32xf32> to vector<8x32xbf16>
    %cst_207 = arith.constant dense<0.000000e+00> : vector<8x128xf32>
    %450 = tpu.matmul %449, %206, %cst_207 {dimension_numbers = #tpu.dot_dimension_numbers<[1], [0], [0], [1], [0, 0, 1, 1], [], []>} : vector<8x32xbf16>, vector<32x128xbf16>, vector<8x128xf32> -> vector<8x128xf32>
    %451 = arith.addf %448, %450 : vector<8x128xf32>
    %452 = vector.extract_strided_slice %451 {offsets = [0, 0], sizes = [8, 32], strides = [1, 1]} : vector<8x128xf32> to vector<8x32xf32>
    %453 = arith.negf %452 : vector<8x32xf32>
    %454 = math.exp %453 : vector<8x32xf32>
    %cst_208 = arith.constant 1.000000e+00 : f32
    %455 = vector.broadcast %cst_208 : f32 to vector<8x32xf32>
    %456 = arith.addf %455, %454 : vector<8x32xf32>
    %457 = arith.divf %455, %456 : vector<8x32xf32>
    %458 = vector.extract_strided_slice %451 {offsets = [0, 32], sizes = [8, 32], strides = [1, 1]} : vector<8x128xf32> to vector<8x32xf32>
    %459 = arith.negf %458 : vector<8x32xf32>
    %460 = math.exp %459 : vector<8x32xf32>
    %cst_209 = arith.constant 1.000000e+00 : f32
    %461 = vector.broadcast %cst_209 : f32 to vector<8x32xf32>
    %462 = arith.addf %461, %460 : vector<8x32xf32>
    %463 = arith.divf %461, %462 : vector<8x32xf32>
    %464 = vector.extract_strided_slice %451 {offsets = [0, 64], sizes = [8, 32], strides = [1, 1]} : vector<8x128xf32> to vector<8x32xf32>
    %465 = math.tanh %464 : vector<8x32xf32>
    %466 = vector.extract_strided_slice %451 {offsets = [0, 96], sizes = [8, 32], strides = [1, 1]} : vector<8x128xf32> to vector<8x32xf32>
    %467 = arith.negf %466 : vector<8x32xf32>
    %468 = math.exp %467 : vector<8x32xf32>
    %cst_210 = arith.constant 1.000000e+00 : f32
    %469 = vector.broadcast %cst_210 : f32 to vector<8x32xf32>
    %470 = arith.addf %469, %468 : vector<8x32xf32>
    %471 = arith.divf %469, %470 : vector<8x32xf32>
    %472 = arith.mulf %463, %440 : vector<8x32xf32>
    %473 = arith.mulf %457, %465 : vector<8x32xf32>
    %474 = arith.addf %472, %473 : vector<8x32xf32>
    %475 = math.tanh %474 : vector<8x32xf32>
    %476 = arith.mulf %471, %475 : vector<8x32xf32>
    %c8_i32 = arith.constant 8 : i32
    %477 = vector.broadcast %c8_i32 : i32 to vector<8x1xi32>
    %478 = arith.cmpi eq, %209, %477 : vector<8x1xi32>
    %479 = vector.shape_cast %478 : vector<8x1xi1> to vector<8x1xi1>
    %480 = vector.broadcast %479 : vector<8x1xi1> to vector<8x32xi1>
    %481 = arith.select %480, %476, %447 : vector<8x32xi1>, vector<8x32xf32>
    %482 = arith.truncf %481 : vector<8x32xf32> to vector<8x32xbf16>
    %c0_211 = arith.constant 0 : index
    %c0_212 = arith.constant 0 : index
    %483 = vector.load %arg14[%c0_211, %c0_212] : memref<32x16xbf16, #tpu.memory_space<vmem>>, vector<32x16xbf16>
    %cst_213 = arith.constant dense<0.000000e+00> : vector<8x16xf32>
    %484 = tpu.matmul %482, %483, %cst_213 {dimension_numbers = #tpu.dot_dimension_numbers<[1], [0], [0], [1], [0, 0, 1, 1], [], []>} : vector<8x32xbf16>, vector<32x16xbf16>, vector<8x16xf32> -> vector<8x16xf32>
    %485 = arith.negf %484 : vector<8x16xf32>
    %486 = math.exp %485 : vector<8x16xf32>
    %cst_214 = arith.constant 1.000000e+00 : f32
    %487 = vector.broadcast %cst_214 : f32 to vector<8x16xf32>
    %488 = arith.addf %487, %486 : vector<8x16xf32>
    %489 = arith.divf %487, %488 : vector<8x16xf32>
    %cst_215 = arith.constant 5.000000e-01 : f32
    %490 = vector.broadcast %cst_215 : f32 to vector<1x16xf32>
    %491 = arith.mulf %490, %182 : vector<1x16xf32>
    %cst_216 = arith.constant 5.000000e-01 : f32
    %492 = vector.broadcast %cst_216 : f32 to vector<1x16xf32>
    %493 = arith.addf %492, %491 : vector<1x16xf32>
    %494 = vector.broadcast %493 : vector<1x16xf32> to vector<8x16xf32>
    %495 = arith.mulf %489, %494 : vector<8x16xf32>
    %c0_217 = arith.constant 0 : index
    %c0_218 = arith.constant 0 : index
    %496 = vector.load %arg15[%c0_217, %c0_218] : memref<8x16xf32, #tpu.memory_space<vmem>>, vector<8x16xf32>
    tpu.vector_store %arg15[%c0_217, %c0_218], %495 {strides = array<i32>} : memref<8x16xf32, #tpu.memory_space<vmem>>, vector<8x16xf32>,
    return
  }
}

</mosaic_0001>

<bundles_post_ra>
// kernel: gtn_rec_forward.1
= control target key start
LH: loop header
LB: loop body
LE: loop exit
PB: predicated region body
PF: predicated region fallthrough
CT: control target
= control target key end

     0   :  { %vm51_vm0 = vcmask 24576   ;;  %s2519_s1 = inlined_call_operand.vmem [shape: f32[1,4], index: 1, kind: input, shape index: {}]   ;;  %s2520_s2 = inlined_call_operand.vmem [shape: f32[1,4], index: 2, kind: input, shape index: {}]   ;;  %s2521_s4 = inlined_call_operand.vmem [shape: f32[1,16], index: 4, kind: input, shape index: {}]   ;;  %s2522_s5 = inlined_call_operand.<no memory space> [shape: f32[1,1], index: 5, kind: input, shape index: {}]   ;;  %s2523_s6 = inlined_call_operand.vmem [shape: bf16[16,32], index: 6, kind: input, shape index: {}]   ;;  %s2524_s7 = inlined_call_operand.vmem [shape: f32[1,32], index: 7, kind: input, shape index: {}]   ;;  %s2525_s8 = inlined_call_operand.vmem [shape: bf16[32,128], index: 8, kind: input, shape index: {}]   ;;  %s2526_s9 = inlined_call_operand.vmem [shape: bf16[32,128], index: 9, kind: input, shape index: {}]   ;;  %s2527_s10 = inlined_call_operand.vmem [shape: f32[1,128], index: 10, kind: input, shape index: {}]   ;;  %s2528_s11 = inlined_call_operand.vmem [shape: f32[8,32], index: 11, kind: input, shape index: {}]   ;;  %s2529_s12 = inlined_call_operand.vmem [shape: f32[8,32], index: 12, kind: input, shape index: {}]   ;;  %s2530_s13 = inlined_call_operand.vmem [shape: s32[8,1], index: 13, kind: input, shape index: {}]   ;;  %s2531_s14 = inlined_call_operand.vmem [shape: bf16[32,16], index: 14, kind: input, shape index: {}]   ;;  %s2532_s15 = inlined_call_operand.vmem [shape: f32[8,16], index: 15, kind: output, shape index: {}]   ;;  %s2533_s0 = inlined_call_operand.vmem [shape: bf16[4,16,16], index: 0, kind: input, shape index: {}]   ;;  %s2534_s3 = inlined_call_operand.vmem [shape: bf16[64,16], index: 3, kind: input, shape index: {}]  }
   0x1   :  { %v50_v0 = vld [vmem:[%s2519_s1] sm:$0x1]  ;;  %v1888_v17 = vld [vmem:[%s2534_s3] sm:$0xf0]  ;;  %v2136_v18 = vld [vmem:[%s2534_s3 + $0x8] sm:$0xff]  }
   0x2   :  { %v52_v1 = vsel %vm51_vm0, %v50_v0, -inf  ;;  %v76_v2 = vld [vmem:[%s2520_s2] sm:$0x1]  ;;  %v1753_v19 = vld [vmem:[%s2534_s3 + $0x8] sm:$0xf]  ;;  %v2147_v21 = vld [vmem:[%s2534_s3 + $0x10] sm:$0xff]  }
   0x3   :  { %53 = vmax.xlane.f32.xlu0 %v52_v1  ;;  %v77_v3 = vsel %vm51_vm0, %v76_v2, -inf  ;;  %v135_v14 = vld [vmem:[%s2533_s0] sm:$0xff]  ;;  %v1889_v20 = vld [vmem:[%s2534_s3 + $0x8] sm:$0xf0]  ;;  %v1757_v22 = vld [vmem:[%s2534_s3 + $0x10] sm:$0xf] }
   0x4   :  { %v2125_v15 = vld [vmem:[%s2534_s3] sm:$0xff]   ;;  %136 = vst [vmem:[#allocation2] sm:$0xff] %v135_v14  ;;  %v1890_v23 = vld [vmem:[%s2534_s3 + $0x10] sm:$0xf0]  ;;  %v2158_v24 = vld [vmem:[%s2534_s3 + $0x18] sm:$0xff]  }
   0x5   :  { %v1749_v16 = vld [vmem:[%s2534_s3] sm:$0xf]  ;;  %v1761_v25 = vld [vmem:[%s2534_s3 + $0x18] sm:$0xf]  ;;  %v1891_v26 = vld [vmem:[%s2534_s3 + $0x18] sm:$0xf0] }
   0xb   :  { %78 = vmax.xlane.f32.xlu0 %v77_v3 }
  0x76   :  { %v54_v4 = vpop.xlane.xlu0 %53 }
  0x77   :  { %v55_v5 = vsub.f32 %v50_v0, %v54_v4 }
  0x79   :  { %v56_v6 = vmul.f32 1.442695, %v55_v5 }
  0x7b   :  { %1914 = vpow2.f32 %v56_v6 }
  0x7e   :  { %v79_v7 = vpop.xlane.xlu0 %78 }
  0x7f   :  { %v80_v8 = vsub.f32 %v76_v2, %v79_v7 }
  0x81   :  { %v1915_v9 = vpop.eup %1914  ;;  %v81_v10 = vmul.f32 1.442695, %v80_v8 }
  0x82   :  { %v58_v11 = vsel %vm51_vm0, %v1915_v9, 0.0 }
  0x83   :  { %1916 = vpow2.f32 %v81_v10  ;;  %59 = vadd.xlane.f32.xlu1 %v58_v11 }
  0x89   :  { %v2115_v12 = vpop.eup %1916 }
  0x8a   :  { %v83_v13 = vsel %vm51_vm0, %v2115_v12, 0.0 }
  0x8b   :  { %84 = vadd.xlane.f32.xlu1 %v83_v13 }
  0xf6   :  { %v60_v27 = vpop.xlane.xlu1 %59 }
  0xf7   :  { %1918 = vrcp.f32 %v60_v27  ;;  %v72_v32 = vand.u32 2147483648, %v60_v27  ;;  %v70_v34 = vand.u32 2147483647, %v60_v27  ;;  %vm66_vm2 = vweird.f32 %v60_v27 }
  0xf9   :  { %v73_v37 = vor.u32 1.1754944e-38, %v72_v32  ;;  %vm71_vm4 = vcmp.eq.f32.partialorder %v70_v34, 8.507059e+37 }
  0xfd   :  { %v1919_v28 = vpop.eup %1918 }
  0xfe   :  { %v62_v29 = vmul.f32 %v1919_v28, %v60_v27  ;;  %v85_v30 = vpop.xlane.xlu1 %84  ;;  %vm67_vm1 = vweird.f32 %v1919_v28 }
  0xff   :  { %1920 = vrcp.f32 %v85_v30  ;;  %vm68_vm3 = vmor %vm66_vm2, %vm67_vm1  ;;  %v97_v43 = vand.u32 2147483648, %v85_v30  ;;  %v95_v45 = vand.u32 2147483647, %v85_v30  ;;  %vm91_vm6 = vweird.f32 %v85_v30 }
 0x100   :  { %v63_v31 = vsub.f32 1.0, %v62_v29 }
 0x101   :  { %v98_v47 = vor.u32 1.1754944e-38, %v97_v43  ;;  %vm96_vm8 = vcmp.eq.f32.partialorder %v95_v45, 8.507059e+37 }
 0x102   :  { %v64_v33 = vmul.f32 %v1919_v28, %v63_v31 }
 0x104   :  { %v65_v35 = vadd.f32 %v1919_v28, %v64_v33 }
 0x105   :  { %v1921_v36 = vpop.eup %1920 }
 0x106   :  { %v69_v38 = vsel %vm68_vm3, %v1919_v28, %v65_v35  ;;  %v87_v39 = vmul.f32 %v1921_v36, %v85_v30  ;;  %vm92_vm5 = vweird.f32 %v1921_v36 }
 0x107   :  { %v74_v40 = vsel %vm71_vm4, %v73_v37, %v69_v38  ;;  %vm93_vm7 = vmor %vm91_vm6, %vm92_vm5 }
 0x108   :  { %v75_v41 = vmul.f32 %v1915_v9, %v74_v40  ;;  %v88_v42 = vsub.f32 1.0, %v87_v39 }
 0x10a   :  { %v89_v44 = vmul.f32 %v1921_v36, %v88_v42 }
 0x10c   :  { %v90_v46 = vadd.f32 %v1921_v36, %v89_v44 }
 0x10e   :  { %v94_v48 = vsel %vm93_vm7, %v1921_v36, %v90_v46 }
 0x10f   :  { %v99_v49 = vsel %vm96_vm8, %v98_v47, %v94_v48 }
 0x110   :  { %v2167_v50 = vmul.f32 %v2115_v12, %v99_v49 }
 0x111   :  { %142 = vsyncadd [#allocation3], 128 }
 0x112   :  { %2003 = dma.done.wait [#allocation3], 128 }
 0x113   :  { %2004 = vsyncadd [#allocation3], 4294967168  ;;  %v1746_v51 = vld [vmem:[%s2533_s0 + $0x8] sm:$0xff] }
 0x114   :  { %177 = vst [vmem:[#allocation2 + $0x8] sm:$0xff] %v1746_v51 }
 0x115   :  { %183 = vsyncadd [#allocation3 + $0x1], 128  ;;  %v1892_v52 = vld [vmem:[#allocation2] sm:$0xff]  ;;  %v2172_v53 = vperm.slane %v75_v41, 0  ;;  %v2174_v54 = vor.u32 %v1888_v17, %v1749_v16  ;;  %v2019_v55 = vmov 0   ;;  %vm212_vm9 = vcmask 130048  }
 0x116   :  { %1922 = vset.pattern.permute.xlu0 %v2019_v55  ;;  %232 = vmatpush.bf16.msra.mxu0 %v1892_v52  ;;  %v2180_v56 = vor.u32 %v1889_v20, %v1753_v19  ;;  %v2184_v57 = vor.u32 %v1890_v23, %v1757_v22  ;;  %v2188_v58 = vor.u32 %v1891_v26, %v1761_v25 }
 0x117   :  { %257 = vperm.xlu0 %1922, %v2172_v53  }
 0x119   :  { %1767 = vmatmul.msk.bf16.vlgmr.msra.gmra.mxu0 %vm212_vm9, %v2174_v54 }
 0x129   :  { %1768 = vmatmul.msk.bf16.gmra.mxu0 %vm212_vm9, %v2180_v56 }
 0x139   :  { %1769 = vmatmul.msk.bf16.gmra.mxu0 %vm212_vm9, %v2184_v57 }
 0x149   :  { %1770 = vmatmul.msk.bf16.gmra.mxu0 %vm212_vm9, %v2188_v58 }
 0x189   :  { %v258_v59 = vpop.permute.xlu0 %257 }
 0x196   :  { %v234_v60 = vpop.f32.mrf.mxu0 }
 0x197   :  { %v260_v61 = vmul.f32 %v258_v59, %v234_v60 }
 0x19e   :  { %v236_v62 = vpop.f32.mrf.mxu0 }
 0x19f   :  { %v261_v63 = vmul.f32 %v258_v59, %v236_v62 }
 0x1a6   :  { %v239_v0 = vpop.f32.mrf.mxu0 }
 0x1a7   :  { %v262_v1 = vmul.f32 %v258_v59, %v239_v0 }
 0x1ae   :  { %v241_v2 = vpop.f32.mrf.mxu0 }
 0x1af   :  { %v263_v3 = vmul.f32 %v258_v59, %v241_v2 }
 0x1b6   :  { %v244_v4 = vpop.f32.mrf.mxu0 }
 0x1b7   :  { %v264_v5 = vmul.f32 %v258_v59, %v244_v4 }
 0x1be   :  { %v246_v6 = vpop.f32.mrf.mxu0 }
 0x1bf   :  { %v265_v7 = vmul.f32 %v258_v59, %v246_v6 }
 0x1c6   :  { %v249_v8 = vpop.f32.mrf.mxu0 }
 0x1c7   :  { %v266_v9 = vmul.f32 %v258_v59, %v249_v8 }
 0x1ce   :  { %v251_v10 = vpop.f32.mrf.mxu0 }
 0x1cf   :  { %v267_v11 = vmul.f32 %v258_v59, %v251_v10 }
 0x1d0   :  { %2005 = dma.done.wait [#allocation3 + $0x1], 128 }
 0x1d1   :  { %2006 = vsyncadd [#allocation3 + $0x1], 4294967168  ;;  %v1771_v12 = vld [vmem:[%s2533_s0 + $0x10] sm:$0xff] }
 0x1d2   :  { %306 = vst [vmem:[#allocation2] sm:$0xff] %v1771_v12 }
 0x1d3   :  { %312 = vsyncadd [#allocation3], 128  ;;  %v1893_v13 = vld [vmem:[#allocation2 + $0x8] sm:$0xff]  ;;  %v2020_v14 = vmov 1  }
 0x1d4   :  { %1923 = vset.pattern.permute.xlu0 %v2020_v14  ;;  %328 = vmatpush.bf16.msra.mxu1 %v1893_v13 }
 0x1d5   :  { %351 = vperm.xlu0 %1923, %v2172_v53  }
 0x1d7   :  { %1776 = vmatmul.msk.bf16.vlgmr.msra.gmra.mxu1 %vm212_vm9, %v2174_v54 }
 0x1e7   :  { %1777 = vmatmul.msk.bf16.gmra.mxu1 %vm212_vm9, %v2180_v56 }
 0x1f7   :  { %1778 = vmatmul.msk.bf16.gmra.mxu1 %vm212_vm9, %v2184_v57 }
 0x207   :  { %1779 = vmatmul.msk.bf16.gmra.mxu1 %vm212_vm9, %v2188_v58 }
 0x247   :  { %v352_v16 = vpop.permute.xlu0 %351 }
 0x254   :  { %v330_v17 = vpop.f32.mrf.mxu1 }
 0x255   :  { %v354_v19 = vmul.f32 %v352_v16, %v330_v17 }
 0x257   :  { %v362_v20 = vadd.f32 %v354_v19, %v260_v61 }
 0x25c   :  { %v332_v22 = vpop.f32.mrf.mxu1 }
 0x25d   :  { %v355_v23 = vmul.f32 %v352_v16, %v332_v22 }
 0x25f   :  { %v363_v25 = vadd.f32 %v355_v23, %v261_v63 }
 0x264   :  { %v335_v26 = vpop.f32.mrf.mxu1 }
 0x265   :  { %v356_v27 = vmul.f32 %v352_v16, %v335_v26 }
 0x267   :  { %v364_v28 = vadd.f32 %v356_v27, %v262_v1 }
 0x26c   :  { %v337_v29 = vpop.f32.mrf.mxu1 }
 0x26d   :  { %v357_v30 = vmul.f32 %v352_v16, %v337_v29 }
 0x26f   :  { %v365_v31 = vadd.f32 %v357_v30, %v263_v3 }
 0x274   :  { %v340_v32 = vpop.f32.mrf.mxu1 }
 0x275   :  { %v358_v33 = vmul.f32 %v352_v16, %v340_v32 }
 0x277   :  { %v366_v34 = vadd.f32 %v358_v33, %v264_v5 }
 0x27c   :  { %v342_v35 = vpop.f32.mrf.mxu1 }
 0x27d   :  { %v359_v36 = vmul.f32 %v352_v16, %v342_v35 }
 0x27f   :  { %v367_v37 = vadd.f32 %v359_v36, %v265_v7 }
 0x284   :  { %v345_v38 = vpop.f32.mrf.mxu1 }
 0x285   :  { %v360_v39 = vmul.f32 %v352_v16, %v345_v38 }
 0x287   :  { %v368_v40 = vadd.f32 %v360_v39, %v266_v9 }
 0x28c   :  { %v347_v41 = vpop.f32.mrf.mxu1 }
 0x28d   :  { %v361_v42 = vmul.f32 %v352_v16, %v347_v41 }
 0x28f   :  { %v369_v43 = vadd.f32 %v361_v42, %v267_v11 }
 0x290   :  { %2007 = dma.done.wait [#allocation3], 128 }
 0x291   :  { %2008 = vsyncadd [#allocation3], 4294967168  ;;  %v1780_v44 = vld [vmem:[%s2533_s0 + $0x18] sm:$0xff] }
 0x292   :  { %400 = vst [vmem:[#allocation2 + $0x8] sm:$0xff] %v1780_v44 }
 0x293   :  { %406 = vsyncadd [#allocation3 + $0x1], 128  ;;  %v1894_v45 = vld [vmem:[#allocation2] sm:$0xff]  ;;  %v2021_v46 = vmov 2  }
 0x294   :  { %1924 = vset.pattern.permute.xlu0 %v2021_v46  ;;  %422 = vmatpush.bf16.msra.mxu2 %v1894_v45 }
 0x295   :  { %445 = vperm.xlu0 %1924, %v2172_v53  }
 0x297   :  { %1785 = vmatmul.msk.bf16.vlgmr.msra.gmra.mxu2 %vm212_vm9, %v2174_v54 }
 0x2a7   :  { %1786 = vmatmul.msk.bf16.gmra.mxu2 %vm212_vm9, %v2180_v56 }
 0x2b7   :  { %1787 = vmatmul.msk.bf16.gmra.mxu2 %vm212_vm9, %v2184_v57 }
 0x2c7   :  { %1788 = vmatmul.msk.bf16.gmra.mxu2 %vm212_vm9, %v2188_v58 }
 0x307   :  { %v446_v47 = vpop.permute.xlu0 %445 }
 0x31a   :  { %v424_v48 = vpop.f32.mrf.mxu2 }
 0x31b   :  { %v448_v49 = vmul.f32 %v446_v47, %v424_v48 }
 0x31d   :  { %v456_v51 = vadd.f32 %v448_v49, %v362_v20 }
 0x322   :  { %v426_v52 = vpop.f32.mrf.mxu2 }
 0x323   :  { %v449_v59 = vmul.f32 %v446_v47, %v426_v52 }
 0x325   :  { %v457_v60 = vadd.f32 %v449_v59, %v363_v25 }
 0x32a   :  { %v429_v61 = vpop.f32.mrf.mxu2 }
 0x32b   :  { %v450_v62 = vmul.f32 %v446_v47, %v429_v61 }
 0x32d   :  { %v458_v63 = vadd.f32 %v450_v62, %v364_v28 }
 0x332   :  { %v431_v0 = vpop.f32.mrf.mxu2 }
 0x333   :  { %v451_v1 = vmul.f32 %v446_v47, %v431_v0 }
 0x335   :  { %v459_v2 = vadd.f32 %v451_v1, %v365_v31 }
 0x33a   :  { %v434_v3 = vpop.f32.mrf.mxu2 }
 0x33b   :  { %v452_v4 = vmul.f32 %v446_v47, %v434_v3 }
 0x33d   :  { %v460_v5 = vadd.f32 %v452_v4, %v366_v34 }
 0x342   :  { %v436_v6 = vpop.f32.mrf.mxu2 }
 0x343   :  { %v453_v7 = vmul.f32 %v446_v47, %v436_v6 }
 0x345   :  { %v461_v8 = vadd.f32 %v453_v7, %v367_v37 }
 0x34a   :  { %v439_v9 = vpop.f32.mrf.mxu2 }
 0x34b   :  { %v454_v10 = vmul.f32 %v446_v47, %v439_v9 }
 0x34d   :  { %v462_v11 = vadd.f32 %v454_v10, %v368_v40 }
 0x352   :  { %v441_v12 = vpop.f32.mrf.mxu2 }
 0x353   :  { %v455_v13 = vmul.f32 %v446_v47, %v441_v12 }
 0x355   :  { %v463_v16 = vadd.f32 %v455_v13, %v369_v43 }
 0x356   :  { %2009 = dma.done.wait [#allocation3 + $0x1], 128 }
 0x357   :  { %2010 = vsyncadd [#allocation3 + $0x1], 4294967168  ;;  %v2022_v17 = vmov 3   ;;  %v553_v19 = vld [vmem:[%s2533_s0] sm:$0xff]  ;;  %v1895_v20 = vld [vmem:[#allocation2 + $0x8] sm:$0xff] }
 0x358   :  { %1925 = vset.pattern.permute.xlu0 %v2022_v17  ;;  %554 = vst [vmem:[#allocation2] sm:$0xff] %v553_v19  ;;  %481 = vmatpush.bf16.msra.mxu3 %v1895_v20 }
 0x359   :  { %504 = vperm.xlu0 %1925, %v2172_v53  }
 0x35b   :  { %1793 = vmatmul.msk.bf16.vlgmr.msra.gmra.mxu3 %vm212_vm9, %v2174_v54 }
 0x36b   :  { %1794 = vmatmul.msk.bf16.gmra.mxu3 %vm212_vm9, %v2180_v56 }
 0x37b   :  { %1795 = vmatmul.msk.bf16.gmra.mxu3 %vm212_vm9, %v2184_v57 }
 0x38b   :  { %1796 = vmatmul.msk.bf16.gmra.mxu3 %vm212_vm9, %v2188_v58 }
 0x3cb   :  { %v505_v22 = vpop.permute.xlu0 %504 }
 0x3de   :  { %v483_v53 = vpop.f32.mrf.mxu3 }
 0x3df   :  { %v507_v23 = vmul.f32 %v505_v22, %v483_v53 }
 0x3e1   :  { %v515_v27 = vadd.f32 %v507_v23, %v456_v51 }
 0x3e6   :  { %v485_v25 = vpop.f32.mrf.mxu3 }
 0x3e7   :  { %v508_v26 = vmul.f32 %v505_v22, %v485_v25 }
 0x3e9   :  { %v516_v28 = vadd.f32 %v508_v26, %v457_v60 }
 0x3eb   :  { %v2231_v29 = vpack.c.bf16 %v516_v28, %v515_v27 }
 0x3ee   :  { %v488_v30 = vpop.f32.mrf.mxu3 }
 0x3ef   :  { %v509_v54 = vmul.f32 %v505_v22, %v488_v30 }
 0x3f1   :  { %v517_v56 = vadd.f32 %v509_v54, %v458_v63 }
 0x3f6   :  { %v490_v31 = vpop.f32.mrf.mxu3 }
 0x3f7   :  { %v510_v32 = vmul.f32 %v505_v22, %v490_v31 }
 0x3f9   :  { %v518_v33 = vadd.f32 %v510_v32, %v459_v2 }
 0x3fb   :  { %v2233_v34 = vpack.c.bf16 %v518_v33, %v517_v56 }
 0x3fe   :  { %v493_v57 = vpop.f32.mrf.mxu3 }
 0x3ff   :  { %v511_v35 = vmul.f32 %v505_v22, %v493_v57 }
 0x401   :  { %v519_v37 = vadd.f32 %v511_v35, %v460_v5 }
 0x406   :  { %v495_v58 = vpop.f32.mrf.mxu3 }
 0x407   :  { %v512_v36 = vmul.f32 %v505_v22, %v495_v58 }
 0x409   :  { %v520_v38 = vadd.f32 %v512_v36, %v461_v8 }
 0x40b   :  { %v2235_v39 = vpack.c.bf16 %v520_v38, %v519_v37 }
 0x40e   :  { %v498_v40 = vpop.f32.mrf.mxu3 }
 0x40f   :  { %v513_v41 = vmul.f32 %v505_v22, %v498_v40 }
 0x411   :  { %v521_v44 = vadd.f32 %v513_v41, %v462_v11 }
 0x416   :  { %v500_v42 = vpop.f32.mrf.mxu3 }
 0x417   :  { %v514_v43 = vmul.f32 %v505_v22, %v500_v42 }
 0x419   :  { %v522_v45 = vadd.f32 %v514_v43, %v463_v16 }
 0x41b   :  { %v2237_v47 = vpack.c.bf16 %v522_v45, %v521_v44 }
 0x41c   :  { %560 = vsyncadd [#allocation3], 128 }
 0x41d   :  { %2011 = dma.done.wait [#allocation3], 128 }
 0x41e   :  { %2012 = vsyncadd [#allocation3], 4294967168  ;;  %v1797_v48 = vld [vmem:[%s2533_s0 + $0x8] sm:$0xff] }
 0x41f   :  { %590 = vst [vmem:[#allocation2 + $0x8] sm:$0xff] %v1797_v48 }
 0x420   :  { %596 = vsyncadd [#allocation3 + $0x1], 128  ;;  %v1896_v49 = vld [vmem:[#allocation2] sm:$0xff]  ;;  %1926 = vset.pattern.permute.xlu0 %v2019_v55  ;;  %v2244_v51 = vperm.slane %v2167_v50, 0 }
 0x421   :  { %624 = vmatpush.bf16.msrb.mxu0 %v1896_v49 }
 0x422   :  { %649 = vperm.xlu0 %1926, %v2244_v51  }
 0x424   :  { %1802 = vmatmul.msk.bf16.vlgmr.msrb.gmra.mxu0 %vm212_vm9, %v2231_v29 }
 0x434   :  { %1803 = vmatmul.msk.bf16.gmra.mxu0 %vm212_vm9, %v2233_v34 }
 0x444   :  { %1804 = vmatmul.msk.bf16.gmra.mxu0 %vm212_vm9, %v2235_v39 }
 0x454   :  { %1805 = vmatmul.msk.bf16.gmra.mxu0 %vm212_vm9, %v2237_v47 }
 0x494   :  { %v650_v52 = vpop.permute.xlu0 %649 }
 0x4a1   :  { %v626_v59 = vpop.f32.mrf.mxu0 }
 0x4a2   :  { %v652_v60 = vmul.f32 %v650_v52, %v626_v59 }
 0x4a9   :  { %v628_v50 = vpop.f32.mrf.mxu0 }
 0x4aa   :  { %v653_v61 = vmul.f32 %v650_v52, %v628_v50 }
 0x4b1   :  { %v631_v62 = vpop.f32.mrf.mxu0 }
 0x4b2   :  { %v654_v63 = vmul.f32 %v650_v52, %v631_v62 }
 0x4b9   :  { %v633_v0 = vpop.f32.mrf.mxu0 }
 0x4ba   :  { %v655_v1 = vmul.f32 %v650_v52, %v633_v0 }
 0x4c1   :  { %v636_v2 = vpop.f32.mrf.mxu0 }
 0x4c2   :  { %v656_v3 = vmul.f32 %v650_v52, %v636_v2 }
 0x4c9   :  { %v638_v4 = vpop.f32.mrf.mxu0 }
 0x4ca   :  { %v657_v5 = vmul.f32 %v650_v52, %v638_v4 }
 0x4d1   :  { %v641_v6 = vpop.f32.mrf.mxu0 }
 0x4d2   :  { %v658_v7 = vmul.f32 %v650_v52, %v641_v6 }
 0x4d9   :  { %v643_v8 = vpop.f32.mrf.mxu0 }
 0x4da   :  { %v659_v9 = vmul.f32 %v650_v52, %v643_v8 }
 0x4db   :  { %2013 = dma.done.wait [#allocation3 + $0x1], 128 }
 0x4dc   :  { %2014 = vsyncadd [#allocation3 + $0x1], 4294967168  ;;  %v1806_v10 = vld [vmem:[%s2533_s0 + $0x10] sm:$0xff] }
 0x4dd   :  { %697 = vst [vmem:[#allocation2] sm:$0xff] %v1806_v10 }
 0x4de   :  { %703 = vsyncadd [#allocation3], 128  ;;  %v1897_v11 = vld [vmem:[#allocation2 + $0x8] sm:$0xff]  ;;  %1927 = vset.pattern.permute.xlu0 %v2020_v14 }
 0x4df   :  { %742 = vperm.xlu0 %1927, %v2244_v51   ;;  %719 = vmatpush.bf16.msrb.mxu1 %v1897_v11 }
 0x4e2   :  { %1811 = vmatmul.msk.bf16.vlgmr.msrb.gmra.mxu1 %vm212_vm9, %v2231_v29 }
 0x4f2   :  { %1812 = vmatmul.msk.bf16.gmra.mxu1 %vm212_vm9, %v2233_v34 }
 0x502   :  { %1813 = vmatmul.msk.bf16.gmra.mxu1 %vm212_vm9, %v2235_v39 }
 0x512   :  { %1814 = vmatmul.msk.bf16.gmra.mxu1 %vm212_vm9, %v2237_v47 }
 0x551   :  { %v743_v12 = vpop.permute.xlu0 %742 }
 0x55f   :  { %v721_v13 = vpop.f32.mrf.mxu1 }
 0x560   :  { %v745_v16 = vmul.f32 %v743_v12, %v721_v13 }
 0x562   :  { %v753_v19 = vadd.f32 %v745_v16, %v652_v60 }
 0x567   :  { %v723_v14 = vpop.f32.mrf.mxu1 }
 0x568   :  { %v746_v20 = vmul.f32 %v743_v12, %v723_v14 }
 0x56a   :  { %v754_v53 = vadd.f32 %v746_v20, %v653_v61 }
 0x56f   :  { %v726_v22 = vpop.f32.mrf.mxu1 }
 0x570   :  { %v747_v23 = vmul.f32 %v743_v12, %v726_v22 }
 0x572   :  { %v755_v25 = vadd.f32 %v747_v23, %v654_v63 }
 0x577   :  { %v728_v26 = vpop.f32.mrf.mxu1 }
 0x578   :  { %v748_v27 = vmul.f32 %v743_v12, %v728_v26 }
 0x57a   :  { %v756_v28 = vadd.f32 %v748_v27, %v655_v1 }
 0x57f   :  { %v731_v30 = vpop.f32.mrf.mxu1 }
 0x580   :  { %v749_v54 = vmul.f32 %v743_v12, %v731_v30 }
 0x582   :  { %v757_v31 = vadd.f32 %v749_v54, %v656_v3 }
 0x587   :  { %v733_v32 = vpop.f32.mrf.mxu1 }
 0x588   :  { %v750_v56 = vmul.f32 %v743_v12, %v733_v32 }
 0x58a   :  { %v758_v33 = vadd.f32 %v750_v56, %v657_v5 }
 0x58f   :  { %v736_v57 = vpop.f32.mrf.mxu1 }
 0x590   :  { %v751_v35 = vmul.f32 %v743_v12, %v736_v57 }
 0x592   :  { %v759_v58 = vadd.f32 %v751_v35, %v658_v7 }
 0x597   :  { %v738_v36 = vpop.f32.mrf.mxu1 }
 0x598   :  { %v752_v37 = vmul.f32 %v743_v12, %v738_v36 }
 0x59a   :  { %v760_v38 = vadd.f32 %v752_v37, %v659_v9 }
 0x59b   :  { %2015 = dma.done.wait [#allocation3], 128 }
 0x59c   :  { %2016 = vsyncadd [#allocation3], 4294967168  ;;  %v1815_v40 = vld [vmem:[%s2533_s0 + $0x18] sm:$0xff] }
 0x59d   :  { %790 = vst [vmem:[#allocation2 + $0x8] sm:$0xff] %v1815_v40 }
 0x59e   :  { %796 = vsyncadd [#allocation3 + $0x1], 128  ;;  %v1898_v41 = vld [vmem:[#allocation2] sm:$0xff]  ;;  %1928 = vset.pattern.permute.xlu0 %v2021_v46 }
 0x59f   :  { %835 = vperm.xlu0 %1928, %v2244_v51   ;;  %812 = vmatpush.bf16.msrb.mxu2 %v1898_v41 }
 0x5a2   :  { %1820 = vmatmul.msk.bf16.vlgmr.msrb.gmra.mxu2 %vm212_vm9, %v2231_v29 }
 0x5b2   :  { %1821 = vmatmul.msk.bf16.gmra.mxu2 %vm212_vm9, %v2233_v34 }
 0x5c2   :  { %1822 = vmatmul.msk.bf16.gmra.mxu2 %vm212_vm9, %v2235_v39 }
 0x5d2   :  { %1823 = vmatmul.msk.bf16.gmra.mxu2 %vm212_vm9, %v2237_v47 }
 0x611   :  { %v836_v42 = vpop.permute.xlu0 %835 }
 0x625   :  { %v814_v43 = vpop.f32.mrf.mxu2 }
 0x626   :  { %v838_v44 = vmul.f32 %v836_v42, %v814_v43 }
 0x628   :  { %v846_v45 = vadd.f32 %v838_v44, %v753_v19 }
 0x62d   :  { %v816_v46 = vpop.f32.mrf.mxu2 }
 0x62e   :  { %v839_v48 = vmul.f32 %v836_v42, %v816_v46 }
 0x630   :  { %v847_v49 = vadd.f32 %v839_v48, %v754_v53 }
 0x635   :  { %v819_v52 = vpop.f32.mrf.mxu2 }
 0x636   :  { %v840_v59 = vmul.f32 %v836_v42, %v819_v52 }
 0x638   :  { %v848_v60 = vadd.f32 %v840_v59, %v755_v25 }
 0x63d   :  { %v821_v50 = vpop.f32.mrf.mxu2 }
 0x63e   :  { %v841_v61 = vmul.f32 %v836_v42, %v821_v50 }
 0x640   :  { %v849_v62 = vadd.f32 %v841_v61, %v756_v28 }
 0x645   :  { %v824_v63 = vpop.f32.mrf.mxu2 }
 0x646   :  { %v842_v0 = vmul.f32 %v836_v42, %v824_v63 }
 0x648   :  { %v2281_v1 = vadd.f32 %v842_v0, %v757_v31 }
 0x64d   :  { %v826_v2 = vpop.f32.mrf.mxu2 }
 0x64e   :  { %v843_v3 = vmul.f32 %v836_v42, %v826_v2 }
 0x650   :  { %v2283_v4 = vadd.f32 %v843_v3, %v758_v33 }
 0x655   :  { %v829_v5 = vpop.f32.mrf.mxu2 }
 0x656   :  { %v844_v6 = vmul.f32 %v836_v42, %v829_v5 }
 0x658   :  { %v2285_v7 = vadd.f32 %v844_v6, %v759_v58 }
 0x65d   :  { %v831_v8 = vpop.f32.mrf.mxu2 }
 0x65e   :  { %v845_v9 = vmul.f32 %v836_v42, %v831_v8 }
 0x660   :  { %v2287_v10 = vadd.f32 %v845_v9, %v760_v38 }
 0x661   :  { %2017 = dma.done.wait [#allocation3 + $0x1], 128 }
 0x662   :  { %2018 = vsyncadd [#allocation3 + $0x1], 4294967168  ;;  %1929 = vset.pattern.permute.xlu0 %v2022_v17  ;;  %1930 = vset.pattern.permute.xlu2 %v2019_v55  ;;  %v1899_v11 = vld [vmem:[#allocation2 + $0x8] sm:$0xff]  ;;  %v1900_v17 = vld [vmem:[%s2523_s6] sm:$0xff]  ;;  %v916_v19 = vunpack.c.l.bf16 %v2125_v15  ;;  %v917_v53 = vunpack.c.h.bf16 %v2125_v15  ;;  %v918_v36 = vunpack.c.l.bf16 %v2136_v18  ;;  %v919_v37 = vunpack.c.h.bf16 %v2136_v18  ;;  %s2023_s1 = smov 32   ;;  %s2024_s2 = smov 64  }
 0x663   :  { %894 = vperm.xlu0 %1929, %v2244_v51   ;;  %1931 = vset.pattern.permute.xlu1 %v2019_v55  ;;  %v2339_v18 = vld [vmem:[%s2526_s9 + $0x8] sm:$0xff]  ;;  %v921_v63 = vunpack.c.h.bf16 %v2147_v21  ;;  %vm1049_vm10 = vcmask 261120   ;;  %s2025_s23 = smov 96  }
 0x664   :  { %871 = vmatpush.bf16.msrb.mxu3 %v1899_v11  ;;  %995 = vmatpush.bf16.msra.mxu0 %v1900_v17 }
 0x665   :  { %1120 = vmatpush.bf16.msra.mxu2 %v2339_v18 }
 0x667   :  { %1828 = vmatmul.msk.bf16.vlgmr.msrb.gmra.mxu3 %vm212_vm9, %v2231_v29  ;;  %v2311_v29 = vld [vmem:[%s2521_s4] sm:$0x1] }
 0x668   :  { %1193 = vmatpush.bf16.msra.mxu3 %v2339_v18 }
 0x66b   :  { %1932 = vset.pattern.permute.xlu0 %v2019_v55 }
 0x677   :  { %1829 = vmatmul.msk.bf16.gmra.mxu3 %vm212_vm9, %v2233_v34 }
 0x687   :  { %1830 = vmatmul.msk.bf16.gmra.mxu3 %vm212_vm9, %v2235_v39  ;;  %v914_v39 = vmax.f32 %v2311_v29, 0.0 }
 0x689   :  { %v925_v22 = vperm.slane %v914_v39, 0 }
 0x68b   :  { %v927_v27 = vmul.f32 %v925_v22, %v916_v19  ;;  %v928_v28 = vmul.f32 %v925_v22, %v917_v53  ;;  %v929_v42 = vmul.f32 %v925_v22, %v918_v36  ;;  %v930_v43 = vmul.f32 %v925_v22, %v919_v37 }
 0x68c   :  { %v932_v5 = vmul.f32 %v925_v22, %v921_v63  ;;  %v923_v19 = vunpack.c.h.bf16 %v2158_v24 }
 0x697   :  { %1831 = vmatmul.msk.bf16.gmra.mxu3 %vm212_vm9, %v2237_v47  ;;  %v2317_v47 = vstv %s2522_s5 }
 0x6d5   :  { %v2305_v51 = vpop.permute.xlu0 %894 }
 0x6ea   :  { %v873_v12 = vpop.f32.mrf.mxu3 }
 0x6eb   :  { %v897_v13 = vmul.f32 %v2305_v51, %v873_v12 }
 0x6ed   :  { %v905_v34 = vadd.f32 %v897_v13, %v846_v45 }
 0x6ef   :  { %v936_v14 = vsub.f32 %v905_v34, %v2317_v47 }
 0x6f1   :  { %v944_v25 = vmax.f32 %v936_v14, 0.0 }
 0x6f2   :  { %v875_v16 = vpop.f32.mrf.mxu3 }
 0x6f3   :  { %v898_v20 = vmul.f32 %v2305_v51, %v875_v16  ;;  %v952_v32 = vadd.f32 %v944_v25, %v927_v27  ;;  %v922_v16 = vunpack.c.l.bf16 %v2158_v24  ;;  %v934_v25 = vmul.f32 %v925_v22, %v923_v19  ;;  %v2368_v24 = vld [vmem:[%s2528_s11] sm:$0xff] }
 0x6f5   :  { %v906_v23 = vadd.f32 %v898_v20, %v847_v49 }
 0x6f7   :  { %v937_v26 = vsub.f32 %v906_v23, %v2317_v47  ;;  %v933_v23 = vmul.f32 %v925_v22, %v922_v16 }
 0x6f9   :  { %v945_v30 = vmax.f32 %v937_v26, 0.0 }
 0x6fa   :  { %v878_v54 = vpop.f32.mrf.mxu3 }
 0x6fb   :  { %v899_v31 = vmul.f32 %v2305_v51, %v878_v54  ;;  %v953_v56 = vadd.f32 %v945_v30, %v928_v28  ;;  %v1933_v54 = vld [vmem:[%s2524_s7] ss:$0 sm:$0xff] }
 0x6fd   :  { %v960_v33 = vpack.c.bf16 %v953_v56, %v952_v32  ;;  %v907_v57 = vadd.f32 %v899_v31, %v848_v60 }
 0x6ff   :  { %1836 = vmatmul.msk.bf16.vlgmr.msra.gmra.mxu0 %vm212_vm9, %v960_v33  ;;  %v938_v35 = vsub.f32 %v907_v57, %v2317_v47 }
 0x701   :  { %v946_v40 = vmax.f32 %v938_v35, 0.0 }
 0x702   :  { %v880_v15 = vpop.f32.mrf.mxu3 }
 0x703   :  { %v900_v58 = vmul.f32 %v2305_v51, %v880_v15  ;;  %v954_v48 = vadd.f32 %v946_v40, %v929_v42 }
 0x705   :  { %v908_v38 = vadd.f32 %v900_v58, %v849_v62  ;;  %v920_v62 = vunpack.c.l.bf16 %v2147_v21 }
 0x707   :  { %v939_v41 = vsub.f32 %v908_v38, %v2317_v47  ;;  %v931_v3 = vmul.f32 %v925_v22, %v920_v62  ;;  %v1901_v22 = vld [vmem:[%s2525_s8] sm:$0xff] }
 0x708   :  { %v1096_v38 = vld [vmem:[%s2529_s12] sm:$0xff] }
 0x709   :  { %v947_v44 = vmax.f32 %v939_v41, 0.0  ;;  %1149 = vrot.lane.b32.xlu1 %v1096_v38, %s2023_s1 }
 0x70a   :  { %v883_v45 = vpop.f32.mrf.mxu3 }
 0x70b   :  { %v901_v46 = vmul.f32 %v2305_v51, %v883_v45  ;;  %v955_v49 = vadd.f32 %v947_v44, %v930_v43 }
 0x70d   :  { %v961_v52 = vpack.c.bf16 %v955_v49, %v954_v48  ;;  %v909_v59 = vadd.f32 %v901_v46, %v2281_v1 }
 0x70f   :  { %1837 = vmatmul.msk.bf16.gmra.mxu0 %vm212_vm9, %v961_v52  ;;  %v940_v50 = vsub.f32 %v909_v59, %v2317_v47 }
 0x711   :  { %v948_v1 = vmax.f32 %v940_v50, 0.0 }
 0x712   :  { %v885_v60 = vpop.f32.mrf.mxu3 }
 0x713   :  { %v902_v61 = vmul.f32 %v2305_v51, %v885_v60  ;;  %v956_v11 = vadd.f32 %v948_v1, %v931_v3  ;;  %v2400_v3 = vld [vmem:[%s2527_s10] ss:$0 sm:$0xff] }
 0x715   :  { %v910_v0 = vadd.f32 %v902_v61, %v2283_v4 }
 0x717   :  { %v941_v2 = vsub.f32 %v910_v0, %v2317_v47 }
 0x719   :  { %v949_v6 = vmax.f32 %v941_v2, 0.0 }
 0x71a   :  { %v888_v8 = vpop.f32.mrf.mxu3 }
 0x71b   :  { %v903_v9 = vmul.f32 %v2305_v51, %v888_v8  ;;  %v957_v17 = vadd.f32 %v949_v6, %v932_v5 }
 0x71d   :  { %v962_v12 = vpack.c.bf16 %v957_v17, %v956_v11  ;;  %v911_v13 = vadd.f32 %v903_v9, %v2285_v7 }
 0x71f   :  { %1838 = vmatmul.msk.bf16.gmra.mxu0 %vm212_vm9, %v962_v12  ;;  %v942_v21 = vsub.f32 %v911_v13, %v2317_v47 }
 0x721   :  { %v950_v20 = vmax.f32 %v942_v21, 0.0 }
 0x722   :  { %v890_v34 = vpop.f32.mrf.mxu3 }
 0x723   :  { %v904_v4 = vmul.f32 %v2305_v51, %v890_v34  ;;  %v958_v7 = vadd.f32 %v950_v20, %v933_v23  ;;  %v2362_v51 = vld [vmem:[%s2526_s9] sm:$0xff] }
 0x724   :  { %1121 = vmatpush.bf16.msra.mxu2 %v2362_v51  ;;  %1194 = vmatpush.bf16.msra.mxu3 %v2362_v51 }
 0x725   :  { %v912_v14 = vadd.f32 %v904_v4, %v2287_v10  ;;  %v1098_v10 = vpack.c.bf16 %v2368_v24, %v2368_v24 }
 0x727   :  { %v943_v53 = vsub.f32 %v912_v14, %v2317_v47  ;;  %1860 = vmatmul.msk.bf16.vlgmr.msra.gmra.mxu2 %vm1049_vm10, %v1098_v10  ;;  %v1902_v47 = vld [vmem:[%s2525_s8 + $0x8] sm:$0xff] }
 0x728   :  { %1258 = vmatpush.bf16.msrb.mxu2 %v2339_v18  ;;  %1323 = vmatpush.bf16.msrb.mxu3 %v2339_v18 }
 0x729   :  { %v951_v26 = vmax.f32 %v943_v53, 0.0  ;;  %1068 = vmatpush.bf16.msra.mxu1 %v1902_v47 }
 0x72b   :  { %v959_v27 = vadd.f32 %v951_v26, %v934_v25 }
 0x72c   :  { %1259 = vmatpush.bf16.msrb.mxu2 %v2362_v51  ;;  %1324 = vmatpush.bf16.msrb.mxu3 %v2362_v51 }
 0x72d   :  { %v963_v28 = vpack.c.bf16 %v959_v27, %v958_v7  ;;  %1069 = vmatpush.bf16.msra.mxu1 %v1901_v22 }
 0x72f   :  { %1839 = vmatmul.msk.bf16.gmra.mxu0 %vm212_vm9, %v963_v28 }
 0x730   :  { %1388 = vmatpush.bf16.msra.mxu2 %v2339_v18 }
 0x734   :  { %1389 = vmatpush.bf16.msra.mxu2 %v2362_v51 }
 0x77b   :  { %v1150_v7 = vpop.permute.xlu1 %1149 }
 0x77c   :  { %v997_v30 = vpop.f32.mrf.mxu0 }
 0x77d   :  { %v998_v31 = vadd.f32 %v1933_v54, %v997_v30 }
 0x77f   :  { %v1017_v33 = vmax.f32 %v998_v31, 0.0 }
 0x784   :  { %v999_v32 = vpop.f32.mrf.mxu0 }
 0x785   :  { %v1000_v56 = vadd.f32 %v1933_v54, %v999_v32 }
 0x787   :  { %v1018_v57 = vmax.f32 %v1000_v56, 0.0 }
 0x789   :  { %v1025_v15 = vpack.c.bf16 %v1018_v57, %v1017_v33 }
 0x78b   :  { %1848 = vmatmul.msk.bf16.vlgmr.msra.gmra.mxu1 %vm1049_vm10, %v1025_v15 }
 0x78c   :  { %v1002_v35 = vpop.f32.mrf.mxu0 }
 0x78d   :  { %v1003_v58 = vadd.f32 %v1933_v54, %v1002_v35 }
 0x78f   :  { %v1019_v40 = vmax.f32 %v1003_v58, 0.0 }
 0x794   :  { %v1004_v36 = vpop.f32.mrf.mxu0 }
 0x795   :  { %v1005_v37 = vadd.f32 %v1933_v54, %v1004_v36 }
 0x797   :  { %v1020_v41 = vmax.f32 %v1005_v37, 0.0 }
 0x799   :  { %v1026_v42 = vpack.c.bf16 %v1020_v41, %v1019_v40 }
 0x79b   :  { %1849 = vmatmul.msk.bf16.gmra.mxu1 %vm1049_vm10, %v1026_v42 }
 0x79c   :  { %v1007_v43 = vpop.f32.mrf.mxu0 }
 0x79d   :  { %v1008_v44 = vadd.f32 %v1933_v54, %v1007_v43 }
 0x79f   :  { %v1021_v48 = vmax.f32 %v1008_v44, 0.0 }
 0x7a4   :  { %v1009_v45 = vpop.f32.mrf.mxu0 }
 0x7a5   :  { %v1010_v46 = vadd.f32 %v1933_v54, %v1009_v45 }
 0x7a7   :  { %v1022_v49 = vmax.f32 %v1010_v46, 0.0 }
 0x7a9   :  { %v1027_v52 = vpack.c.bf16 %v1022_v49, %v1021_v48 }
 0x7aa   :  { %v1123_v1 = vpop.f32.mrf.mxu2 }
 0x7ab   :  { %1850 = vmatmul.msk.bf16.gmra.mxu1 %vm1049_vm10, %v1027_v52 }
 0x7ac   :  { %v1012_v59 = vpop.f32.mrf.mxu0 }
 0x7ad   :  { %v1013_v60 = vadd.f32 %v1933_v54, %v1012_v59 }
 0x7af   :  { %v1023_v62 = vmax.f32 %v1013_v60, 0.0 }
 0x7b2   :  { %v1125_v2 = vpop.f32.mrf.mxu2 }
 0x7b4   :  { %v1014_v50 = vpop.f32.mrf.mxu0 }
 0x7b5   :  { %v1015_v61 = vadd.f32 %v1933_v54, %v1014_v50 }
 0x7b7   :  { %v1024_v63 = vmax.f32 %v1015_v61, 0.0 }
 0x7b9   :  { %v1028_v0 = vpack.c.bf16 %v1024_v63, %v1023_v62 }
 0x7bb   :  { %1851 = vmatmul.msk.bf16.gmra.mxu1 %vm1049_vm10, %v1028_v0 }
 0x808   :  { %v1071_v5 = vpop.f32.mrf.mxu1 }
 0x809   :  { %v1072_v6 = vadd.f32 %v2400_v3, %v1071_v5 }
 0x80b   :  { %v1127_v8 = vadd.f32 %v1123_v1, %v1072_v6 }
 0x80d   :  { %1935 = vtanh.f32 %v1127_v8  ;;  %v1861_v11 = vmul.f32 -1.442695, %v1127_v8 }
 0x80f   :  { %1937 = vpow2.f32 %v1861_v11 }
 0x810   :  { %v1073_v32 = vpop.f32.mrf.mxu1 }
 0x811   :  { %v1074_v56 = vadd.f32 %v2400_v3, %v1073_v32 }
 0x813   :  { %v1936_v9 = vpop.eup %1935 }
 0x814   :  { %1154 = vrot.lane.b32.xlu0 %v1936_v9, %s2024_s2 }
 0x815   :  { %v1938_v17 = vpop.eup %1937 }
 0x816   :  { %v1131_v12 = vadd.f32 1.0, %v1938_v17 }
 0x818   :  { %1939 = vrcp.f32 %v1131_v12  ;;  %v1143_v19 = vand.u32 2147483648, %v1131_v12  ;;  %vm1137_vm12 = vweird.f32 %v1131_v12  ;;  %v1141_v14 = vand.u32 2147483647, %v1131_v12  ;;  %v1076_v5 = vpop.f32.mrf.mxu1 }
 0x819   :  { %v1077_v6 = vadd.f32 %v2400_v3, %v1076_v5 }
 0x81a   :  { %v1144_v53 = vor.u32 1.1754944e-38, %v1143_v19  ;;  %vm1142_vm14 = vcmp.eq.f32.partialorder %v1141_v14, 8.507059e+37 }
 0x81e   :  { %v1940_v13 = vpop.eup %1939 }
 0x81f   :  { %v1133_v34 = vmul.f32 %v1940_v13, %v1131_v12  ;;  %vm1138_vm11 = vweird.f32 %v1940_v13 }
 0x820   :  { %vm1139_vm13 = vmor %vm1137_vm12, %vm1138_vm11 }
 0x821   :  { %v1134_v21 = vsub.f32 1.0, %v1133_v34 }
 0x823   :  { %v1135_v4 = vmul.f32 %v1940_v13, %v1134_v21 }
 0x825   :  { %v1136_v16 = vadd.f32 %v1940_v13, %v1135_v4 }
 0x827   :  { %v1140_v20 = vsel %vm1139_vm13, %v1940_v13, %v1136_v16 }
 0x828   :  { %v1145_v23 = vsel %vm1142_vm14, %v1144_v53, %v1140_v20 }
 0x829   :  { %v1152_v27 = vmul.f32 %v1150_v7, %v1145_v23 }
 0x886   :  { %v1155_v25 = vpop.permute.xlu0 %1154 }
 0x887   :  { %v1157_v26 = vmul.f32 %v1155_v25, %v1145_v23 }
 0x889   :  { %1159 = vrot.lane.b32.xlu1 %v1157_v26, %s2023_s1 }
 0x8fb   :  { %v1160_v28 = vpop.permute.xlu1 %1159 }
 0x8fc   :  { %v1162_v10 = vadd.f32 %v1160_v28, %v1152_v27 }
 0x8fe   :  { %1941 = vtanh.f32 %v1162_v10 }
 0x904   :  { %v1942_v47 = vpop.eup %1941 }
 0x905   :  { %1165 = vrot.lane.b32.xlu2 %v1942_v47, %s2024_s2 }
 0x95f   :  { %v1166_v22 = vpop.permute.xlu2 %1165 }
 0x960   :  { %v2406_v30 = vmul.f32 %v1166_v22, %v1145_v23 }
 0x962   :  { %v1180_v54 = vpack.c.bf16 %v2406_v30, %v2406_v30 }
 0x964   :  { %1182 = vrot.lane.b32.xlu2 %v1180_v54, %s2023_s1 }
 0x9be   :  { %v1183_v31 = vpop.permute.xlu2 %1182 }
 0x9bf   :  { %1862 = vmatmul.msk.bf16.vlgmr.msra.gmra.mxu3 %vm1049_vm10, %v1183_v31 }
 0x9c0   :  { %1453 = vmatpush.bf16.msra.mxu3 %v2339_v18 }
 0x9c4   :  { %1454 = vmatpush.bf16.msra.mxu3 %v2362_v51 }
 0xa42   :  { %v1196_v33 = vpop.f32.mrf.mxu3 }
 0xa43   :  { %v1200_v57 = vadd.f32 %v1196_v33, %v1074_v56  ;;  %v1078_v33 = vpop.f32.mrf.mxu1 }
 0xa45   :  { %1943 = vtanh.f32 %v1200_v57  ;;  %v1863_v58 = vmul.f32 -1.442695, %v1200_v57  ;;  %v1079_v57 = vadd.f32 %v2400_v3, %v1078_v33 }
 0xa47   :  { %1945 = vpow2.f32 %v1863_v58 }
 0xa4a   :  { %v1198_v15 = vpop.f32.mrf.mxu3 }
 0xa4b   :  { %v1944_v35 = vpop.eup %1943 }
 0xa4c   :  { %1223 = vrot.lane.b32.xlu0 %v1944_v35, %s2024_s2 }
 0xa4d   :  { %v1946_v36 = vpop.eup %1945 }
 0xa4e   :  { %v1204_v37 = vadd.f32 1.0, %v1946_v36 }
 0xa50   :  { %1947 = vrcp.f32 %v1204_v37  ;;  %v1216_v44 = vand.u32 2147483648, %v1204_v37  ;;  %vm1210_vm0 = vweird.f32 %v1204_v37  ;;  %v1214_v45 = vand.u32 2147483647, %v1204_v37 }
 0xa52   :  { %v1217_v48 = vor.u32 1.1754944e-38, %v1216_v44  ;;  %vm1215_vm2 = vcmp.eq.f32.partialorder %v1214_v45, 8.507059e+37 }
 0xa56   :  { %v1948_v38 = vpop.eup %1947 }
 0xa57   :  { %v1206_v40 = vmul.f32 %v1948_v38, %v1204_v37  ;;  %vm1211_vm15 = vweird.f32 %v1948_v38 }
 0xa58   :  { %vm1212_vm1 = vmor %vm1210_vm0, %vm1211_vm15 }
 0xa59   :  { %v1207_v41 = vsub.f32 1.0, %v1206_v40 }
 0xa5b   :  { %v1208_v42 = vmul.f32 %v1948_v38, %v1207_v41 }
 0xa5d   :  { %v1209_v43 = vadd.f32 %v1948_v38, %v1208_v42 }
 0xa5f   :  { %v1213_v46 = vsel %vm1212_vm1, %v1948_v38, %v1209_v43 }
 0xa60   :  { %v1218_v52 = vsel %vm1215_vm2, %v1217_v48, %v1213_v46 }
 0xa61   :  { %v1221_v60 = vmul.f32 %v1218_v52, %v1162_v10 }
 0xabe   :  { %v1224_v49 = vpop.permute.xlu0 %1223 }
 0xabf   :  { %v1226_v59 = vmul.f32 %v1224_v49, %v1218_v52 }
 0xac1   :  { %1228 = vrot.lane.b32.xlu1 %v1226_v59, %s2023_s1 }
 0xb33   :  { %v1229_v50 = vpop.permute.xlu1 %1228 }
 0xb34   :  { %v1231_v61 = vadd.f32 %v1229_v50, %v1221_v60 }
 0xb36   :  { %1949 = vtanh.f32 %v1231_v61 }
 0xb3c   :  { %v1950_v62 = vpop.eup %1949 }
 0xb3d   :  { %1234 = vrot.lane.b32.xlu2 %v1950_v62, %s2024_s2 }
 0xb97   :  { %v1235_v63 = vpop.permute.xlu2 %1234 }
 0xb98   :  { %v2418_v0 = vmul.f32 %v1235_v63, %v1218_v52 }
 0xb9a   :  { %v1245_v1 = vpack.c.bf16 %v2418_v0, %v2418_v0 }
 0xb9c   :  { %1247 = vrot.lane.b32.xlu0 %v1245_v1, %s2023_s1 }
 0xc0e   :  { %v1248_v2 = vpop.permute.xlu0 %1247 }
 0xc0f   :  { %1864 = vmatmul.msk.bf16.vlgmr.msrb.gmra.mxu2 %vm1049_vm10, %v1248_v2 }
 0xc10   :  { %1518 = vmatpush.bf16.msrb.mxu2 %v2339_v18 }
 0xc14   :  { %1519 = vmatpush.bf16.msrb.mxu2 %v2362_v51 }
 0xc92   :  { %v1261_v8 = vpop.f32.mrf.mxu2 }
 0xc93   :  { %v1265_v9 = vadd.f32 %v1261_v8, %v1077_v6  ;;  %v1081_v6 = vpop.f32.mrf.mxu1 }
 0xc94   :  { %v1082_v8 = vadd.f32 %v2400_v3, %v1081_v6 }
 0xc95   :  { %1951 = vtanh.f32 %v1265_v9  ;;  %v1865_v12 = vmul.f32 -1.442695, %v1265_v9 }
 0xc97   :  { %1953 = vpow2.f32 %v1865_v12 }
 0xc9a   :  { %v1263_v11 = vpop.f32.mrf.mxu2 }
 0xc9b   :  { %v1952_v17 = vpop.eup %1951 }
 0xc9c   :  { %1288 = vrot.lane.b32.xlu1 %v1952_v17, %s2024_s2 }
 0xc9d   :  { %v1954_v13 = vpop.eup %1953 }
 0xc9e   :  { %v1269_v34 = vadd.f32 1.0, %v1954_v13 }
 0xca0   :  { %1955 = vrcp.f32 %v1269_v34  ;;  %v1281_v20 = vand.u32 2147483648, %v1269_v34  ;;  %vm1275_vm4 = vweird.f32 %v1269_v34  ;;  %v1279_v53 = vand.u32 2147483647, %v1269_v34 }
 0xca2   :  { %v1282_v25 = vor.u32 1.1754944e-38, %v1281_v20  ;;  %vm1280_vm6 = vcmp.eq.f32.partialorder %v1279_v53, 8.507059e+37 }
 0xca6   :  { %v1956_v21 = vpop.eup %1955 }
 0xca7   :  { %v1271_v4 = vmul.f32 %v1956_v21, %v1269_v34  ;;  %vm1276_vm3 = vweird.f32 %v1956_v21 }
 0xca8   :  { %vm1277_vm5 = vmor %vm1275_vm4, %vm1276_vm3 }
 0xca9   :  { %v1272_v16 = vsub.f32 1.0, %v1271_v4 }
 0xcab   :  { %v1273_v19 = vmul.f32 %v1956_v21, %v1272_v16 }
 0xcad   :  { %v1274_v14 = vadd.f32 %v1956_v21, %v1273_v19 }
 0xcaf   :  { %v1278_v23 = vsel %vm1277_vm5, %v1956_v21, %v1274_v14 }
 0xcb0   :  { %v1283_v7 = vsel %vm1280_vm6, %v1282_v25, %v1278_v23 }
 0xcb1   :  { %v1286_v28 = vmul.f32 %v1283_v7, %v1231_v61 }
 0xd0e   :  { %v1289_v26 = vpop.permute.xlu1 %1288 }
 0xd0f   :  { %v1291_v27 = vmul.f32 %v1289_v26, %v1283_v7 }
 0xd11   :  { %1293 = vrot.lane.b32.xlu2 %v1291_v27, %s2023_s1 }
 0xd6b   :  { %v1294_v10 = vpop.permute.xlu2 %1293 }
 0xd6c   :  { %v1296_v47 = vadd.f32 %v1294_v10, %v1286_v28 }
 0xd6e   :  { %1957 = vtanh.f32 %v1296_v47 }
 0xd74   :  { %v1958_v22 = vpop.eup %1957 }
 0xd75   :  { %1299 = vrot.lane.b32.xlu0 %v1958_v22, %s2024_s2 }
 0xde7   :  { %v1300_v54 = vpop.permute.xlu0 %1299 }
 0xde8   :  { %v2430_v31 = vmul.f32 %v1300_v54, %v1283_v7 }
 0xdea   :  { %v1310_v32 = vpack.c.bf16 %v2430_v31, %v2430_v31 }
 0xdec   :  { %1312 = vrot.lane.b32.xlu1 %v1310_v32, %s2023_s1 }
 0xe5e   :  { %v1313_v56 = vpop.permute.xlu1 %1312 }
 0xe5f   :  { %1866 = vmatmul.msk.bf16.vlgmr.msrb.gmra.mxu3 %vm1049_vm10, %v1313_v56 }
 0xe60   :  { %1583 = vmatpush.bf16.msrb.mxu3 %v2339_v18 }
 0xe64   :  { %1584 = vmatpush.bf16.msrb.mxu3 %v2362_v51 }
 0xee2   :  { %v1326_v15 = vpop.f32.mrf.mxu3 }
 0xee3   :  { %v1330_v35 = vadd.f32 %v1326_v15, %v1079_v57  ;;  %v1083_v15 = vpop.f32.mrf.mxu1 }
 0xee5   :  { %1959 = vtanh.f32 %v1330_v35  ;;  %v1867_v37 = vmul.f32 -1.442695, %v1330_v35  ;;  %v1084_v35 = vadd.f32 %v2400_v3, %v1083_v15 }
 0xee7   :  { %1961 = vpow2.f32 %v1867_v37 }
 0xeea   :  { %v1328_v58 = vpop.f32.mrf.mxu3 }
 0xeeb   :  { %v1960_v36 = vpop.eup %1959 }
 0xeec   :  { %1353 = vrot.lane.b32.xlu2 %v1960_v36, %s2024_s2 }
 0xeed   :  { %v1962_v38 = vpop.eup %1961 }
 0xeee   :  { %v1334_v40 = vadd.f32 1.0, %v1962_v38 }
 0xef0   :  { %1963 = vrcp.f32 %v1334_v40  ;;  %v1346_v44 = vand.u32 2147483648, %v1334_v40  ;;  %vm1340_vm8 = vweird.f32 %v1334_v40  ;;  %v1344_v45 = vand.u32 2147483647, %v1334_v40 }
 0xef2   :  { %v1347_v48 = vor.u32 1.1754944e-38, %v1346_v44  ;;  %vm1345_vm12 = vcmp.eq.f32.partialorder %v1344_v45, 8.507059e+37 }
 0xef6   :  { %v1964_v41 = vpop.eup %1963 }
 0xef7   :  { %v1336_v42 = vmul.f32 %v1964_v41, %v1334_v40  ;;  %vm1341_vm7 = vweird.f32 %v1964_v41 }
 0xef8   :  { %vm1342_vm11 = vmor %vm1340_vm8, %vm1341_vm7 }
 0xef9   :  { %v1337_v18 = vsub.f32 1.0, %v1336_v42 }
 0xefb   :  { %v1338_v43 = vmul.f32 %v1964_v41, %v1337_v18 }
 0xefd   :  { %v1339_v51 = vadd.f32 %v1964_v41, %v1338_v43 }
 0xeff   :  { %v1343_v46 = vsel %vm1342_vm11, %v1964_v41, %v1339_v51 }
 0xf00   :  { %v1348_v52 = vsel %vm1345_vm12, %v1347_v48, %v1343_v46 }
 0xf01   :  { %v1351_v60 = vmul.f32 %v1348_v52, %v1296_v47 }
 0xf46   :  { %v1354_v49 = vpop.permute.xlu2 %1353 }
 0xf47   :  { %v1356_v59 = vmul.f32 %v1354_v49, %v1348_v52 }
 0xf49   :  { %1358 = vrot.lane.b32.xlu0 %v1356_v59, %s2023_s1 }
 0xfbb   :  { %v1359_v50 = vpop.permute.xlu0 %1358 }
 0xfbc   :  { %v1361_v61 = vadd.f32 %v1359_v50, %v1351_v60 }
 0xfbe   :  { %1965 = vtanh.f32 %v1361_v61 }
 0xfc4   :  { %v1966_v62 = vpop.eup %1965 }
 0xfc5   :  { %1364 = vrot.lane.b32.xlu1 %v1966_v62, %s2024_s2 }
0x1037   :  { %v1365_v63 = vpop.permute.xlu1 %1364 }
0x1038   :  { %v2442_v1 = vmul.f32 %v1365_v63, %v1348_v52 }
0x103a   :  { %v1375_v2 = vpack.c.bf16 %v2442_v1, %v2442_v1 }
0x103c   :  { %1377 = vrot.lane.b32.xlu2 %v1375_v2, %s2023_s1 }
0x1096   :  { %v1378_v5 = vpop.permute.xlu2 %1377 }
0x1097   :  { %1868 = vmatmul.msk.bf16.vlgmr.msra.gmra.mxu2 %vm1049_vm10, %v1378_v5 }
0x111a   :  { %v1391_v9 = vpop.f32.mrf.mxu2 }
0x111b   :  { %v1395_v11 = vadd.f32 %v1391_v9, %v1082_v8 }
0x111d   :  { %1967 = vtanh.f32 %v1395_v11  ;;  %v1869_v13 = vmul.f32 -1.442695, %v1395_v11  ;;  %v1086_v11 = vpop.f32.mrf.mxu1 }
0x111f   :  { %1969 = vpow2.f32 %v1869_v13 }
0x1122   :  { %v1393_v17 = vpop.f32.mrf.mxu2 }
0x1123   :  { %v1968_v12 = vpop.eup %1967  ;;  %v1087_v17 = vadd.f32 %v2400_v3, %v1086_v11 }
0x1124   :  { %1418 = vrot.lane.b32.xlu0 %v1968_v12, %s2024_s2 }
0x1125   :  { %v1970_v34 = vpop.eup %1969 }
0x1126   :  { %v1399_v21 = vadd.f32 1.0, %v1970_v34 }
0x1128   :  { %1971 = vrcp.f32 %v1399_v21  ;;  %v1411_v53 = vand.u32 2147483648, %v1399_v21  ;;  %vm1405_vm14 = vweird.f32 %v1399_v21  ;;  %v1409_v23 = vand.u32 2147483647, %v1399_v21 }
0x112a   :  { %v1412_v26 = vor.u32 1.1754944e-38, %v1411_v53  ;;  %vm1410_vm0 = vcmp.eq.f32.partialorder %v1409_v23, 8.507059e+37 }
0x112e   :  { %v1972_v4 = vpop.eup %1971 }
0x112f   :  { %v1401_v16 = vmul.f32 %v1972_v4, %v1399_v21  ;;  %vm1406_vm13 = vweird.f32 %v1972_v4 }
0x1130   :  { %vm1407_vm15 = vmor %vm1405_vm14, %vm1406_vm13 }
0x1131   :  { %v1402_v19 = vsub.f32 1.0, %v1401_v16 }
0x1133   :  { %v1403_v14 = vmul.f32 %v1972_v4, %v1402_v19 }
0x1135   :  { %v1404_v20 = vadd.f32 %v1972_v4, %v1403_v14 }
0x1137   :  { %v1408_v25 = vsel %vm1407_vm15, %v1972_v4, %v1404_v20 }
0x1138   :  { %v1413_v27 = vsel %vm1410_vm0, %v1412_v26, %v1408_v25 }
0x1139   :  { %v1416_v10 = vmul.f32 %v1413_v27, %v1361_v61 }
0x1196   :  { %v1419_v7 = vpop.permute.xlu0 %1418 }
0x1197   :  { %v1421_v28 = vmul.f32 %v1419_v7, %v1413_v27 }
0x1199   :  { %1423 = vrot.lane.b32.xlu1 %v1421_v28, %s2023_s1 }
0x120b   :  { %v1424_v47 = vpop.permute.xlu1 %1423 }
0x120c   :  { %v1426_v22 = vadd.f32 %v1424_v47, %v1416_v10 }
0x120e   :  { %1973 = vtanh.f32 %v1426_v22 }
0x1214   :  { %v1974_v54 = vpop.eup %1973 }
0x1215   :  { %1429 = vrot.lane.b32.xlu2 %v1974_v54, %s2024_s2 }
0x126f   :  { %v1430_v32 = vpop.permute.xlu2 %1429 }
0x1270   :  { %v2452_v56 = vmul.f32 %v1430_v32, %v1413_v27 }
0x1272   :  { %v1440_v33 = vpack.c.bf16 %v2452_v56, %v2452_v56 }
0x1274   :  { %1442 = vrot.lane.b32.xlu0 %v1440_v33, %s2023_s1 }
0x12e6   :  { %v1443_v57 = vpop.permute.xlu0 %1442 }
0x12e7   :  { %1870 = vmatmul.msk.bf16.vlgmr.msra.gmra.mxu3 %vm1049_vm10, %v1443_v57 }
0x136a   :  { %v1456_v58 = vpop.f32.mrf.mxu3 }
0x136b   :  { %v1460_v36 = vadd.f32 %v1456_v58, %v1084_v35 }
0x136d   :  { %1975 = vtanh.f32 %v1460_v36  ;;  %v1871_v40 = vmul.f32 -1.442695, %v1460_v36 }
0x136f   :  { %1977 = vpow2.f32 %v1871_v40  ;;  %v1088_v40 = vpop.f32.mrf.mxu1 }
0x1372   :  { %v1458_v37 = vpop.f32.mrf.mxu3 }
0x1373   :  { %v1976_v38 = vpop.eup %1975  ;;  %v1097_v37 = vld [vmem:[%s2530_s13] sm:$0xff] }
0x1374   :  { %1483 = vrot.lane.b32.xlu1 %v1976_v38, %s2024_s2  ;;  %vm1169_vm11 = vcmp.eq.s32.totalorder %v1097_v37, 1  ;;  %vm1368_vm12 = vcmp.eq.s32.totalorder %v1097_v37, 4  ;;  %vm1303_vm15 = vcmp.eq.s32.totalorder %v1097_v37, 3  ;;  %vm1628_vm0 = vcmp.eq.s32.totalorder %v1097_v37, 8 }
0x1375   :  { %v1978_v41 = vpop.eup %1977  ;;  %v1170_v38 = vsel %vm1169_vm11, 1, %v2019_v55 }
0x1376   :  { %v1464_v42 = vadd.f32 1.0, %v1978_v41  ;;  %v1089_v41 = vadd.f32 %v2400_v3, %v1088_v40 }
0x1378   :  { %1979 = vrcp.f32 %v1464_v42  ;;  %v1476_v46 = vand.u32 2147483648, %v1464_v42  ;;  %vm1470_vm2 = vweird.f32 %v1464_v42  ;;  %v1474_v48 = vand.u32 2147483647, %v1464_v42 }
0x137a   :  { %v1477_v52 = vor.u32 1.1754944e-38, %v1476_v46  ;;  %vm1475_vm4 = vcmp.eq.f32.partialorder %v1474_v48, 8.507059e+37 }
0x137e   :  { %v1980_v18 = vpop.eup %1979 }
0x137f   :  { %v1466_v43 = vmul.f32 %v1980_v18, %v1464_v42  ;;  %vm1471_vm1 = vweird.f32 %v1980_v18 }
0x1380   :  { %vm1472_vm3 = vmor %vm1470_vm2, %vm1471_vm1 }
0x1381   :  { %v1467_v51 = vsub.f32 1.0, %v1466_v43 }
0x1383   :  { %v1468_v44 = vmul.f32 %v1980_v18, %v1467_v51 }
0x1385   :  { %v1469_v45 = vadd.f32 %v1980_v18, %v1468_v44 }
0x1387   :  { %v1473_v49 = vsel %vm1472_vm3, %v1980_v18, %v1469_v45  ;;  %vm1498_vm3 = vcmp.eq.s32.totalorder %v1097_v37, 6 }
0x1388   :  { %v1478_v60 = vsel %vm1475_vm4, %v1477_v52, %v1473_v49  ;;  %v1369_v49 = vsel %vm1368_vm12, 1, %v2019_v55  ;;  %v1499_v11 = vsel %vm1498_vm3, 1, %v2019_v55  ;;  %vm1238_vm4 = vcmp.eq.s32.totalorder %v1097_v37, 2 }
0x1389   :  { %v1481_v61 = vmul.f32 %v1478_v60, %v1426_v22 }
0x13e6   :  { %v1484_v59 = vpop.permute.xlu1 %1483 }
0x13e7   :  { %v1486_v50 = vmul.f32 %v1484_v59, %v1478_v60 }
0x13e9   :  { %1488 = vrot.lane.b32.xlu2 %v1486_v50, %s2023_s1 }
0x1443   :  { %v1489_v62 = vpop.permute.xlu2 %1488 }
0x1444   :  { %v1491_v63 = vadd.f32 %v1489_v62, %v1481_v61  ;;  %v1629_v62 = vsel %vm1628_vm0, 1, %v2019_v55 }
0x1446   :  { %1981 = vtanh.f32 %v1491_v63 }
0x144c   :  { %v1982_v2 = vpop.eup %1981 }
0x144d   :  { %1494 = vrot.lane.b32.xlu0 %v1982_v2, %s2024_s2 }
0x14bf   :  { %v1495_v5 = vpop.permute.xlu0 %1494 }
0x14c0   :  { %v2462_v6 = vmul.f32 %v1495_v5, %v1478_v60 }
0x14c2   :  { %v1505_v8 = vpack.c.bf16 %v2462_v6, %v2462_v6 }
0x14c4   :  { %1507 = vrot.lane.b32.xlu1 %v1505_v8, %s2023_s1 }
0x1536   :  { %v1508_v9 = vpop.permute.xlu1 %1507 }
0x1537   :  { %1872 = vmatmul.msk.bf16.vlgmr.msrb.gmra.mxu2 %vm1049_vm10, %v1508_v9 }
0x15ba   :  { %v1521_v12 = vpop.f32.mrf.mxu2 }
0x15bb   :  { %v1525_v13 = vadd.f32 %v1521_v12, %v1087_v17  ;;  %v1239_v17 = vsel %vm1238_vm4, 1, %v2019_v55 }
0x15bd   :  { %1983 = vtanh.f32 %v1525_v13  ;;  %v1873_v4 = vmul.f32 -1.442695, %v1525_v13 }
0x15bf   :  { %1985 = vpow2.f32 %v1873_v4 }
0x15c2   :  { %v1523_v34 = vpop.f32.mrf.mxu2 }
0x15c3   :  { %v1984_v21 = vpop.eup %1983 }
0x15c4   :  { %1548 = vrot.lane.b32.xlu2 %v1984_v21, %s2024_s2 }
0x15c5   :  { %v1986_v16 = vpop.eup %1985 }
0x15c6   :  { %v1529_v19 = vadd.f32 1.0, %v1986_v16 }
0x15c8   :  { %1987 = vrcp.f32 %v1529_v19  ;;  %v1541_v26 = vand.u32 2147483648, %v1529_v19  ;;  %vm1535_vm6 = vweird.f32 %v1529_v19  ;;  %v1539_v7 = vand.u32 2147483647, %v1529_v19 }
0x15ca   :  { %v1542_v28 = vor.u32 1.1754944e-38, %v1541_v26  ;;  %vm1540_vm8 = vcmp.eq.f32.partialorder %v1539_v7, 8.507059e+37 }
0x15ce   :  { %v1988_v14 = vpop.eup %1987 }
0x15cf   :  { %v1531_v20 = vmul.f32 %v1988_v14, %v1529_v19  ;;  %vm1536_vm5 = vweird.f32 %v1988_v14 }
0x15d0   :  { %vm1537_vm7 = vmor %vm1535_vm6, %vm1536_vm5  ;;  %vm1433_vm5 = vcmp.eq.s32.totalorder %v1097_v37, 5  ;;  %vm1563_vm6 = vcmp.eq.s32.totalorder %v1097_v37, 7 }
0x15d1   :  { %v1532_v53 = vsub.f32 1.0, %v1531_v20  ;;  %v1434_v12 = vsel %vm1433_vm5, 1, %v2019_v55  ;;  %v1564_v13 = vsel %vm1563_vm6, 1, %v2019_v55 }
0x15d3   :  { %v1533_v23 = vmul.f32 %v1988_v14, %v1532_v53 }
0x15d5   :  { %v1534_v25 = vadd.f32 %v1988_v14, %v1533_v23 }
0x15d7   :  { %v1538_v27 = vsel %vm1537_vm7, %v1988_v14, %v1534_v25  ;;  %v1906_v14 = vld [vmem:[%s2531_s14 + $0x8] sm:$0xff] }
0x15d8   :  { %v1543_v47 = vsel %vm1540_vm8, %v1542_v28, %v1538_v27  ;;  %1664 = vmatpush.bf16.msrb.mxu0 %v1906_v14 }
0x15d9   :  { %v1546_v54 = vmul.f32 %v1543_v47, %v1491_v63 }
0x161e   :  { %v1549_v10 = vpop.permute.xlu2 %1548 }
0x161f   :  { %v1551_v22 = vmul.f32 %v1549_v10, %v1543_v47 }
0x1621   :  { %1553 = vrot.lane.b32.xlu0 %v1551_v22, %s2023_s1 }
0x1693   :  { %v1554_v32 = vpop.permute.xlu0 %1553 }
0x1694   :  { %v2471_v33 = vadd.f32 %v1554_v32, %v1546_v54 }
0x1696   :  { %1989 = vtanh.f32 %v2471_v33 }
0x169c   :  { %v1990_v57 = vpop.eup %1989 }
0x169d   :  { %1559 = vrot.lane.b32.xlu1 %v1990_v57, %s2024_s2 }
0x170f   :  { %v1560_v15 = vpop.permute.xlu1 %1559 }
0x1710   :  { %v2475_v35 = vmul.f32 %v1560_v15, %v1543_v47 }
0x1712   :  { %v1570_v58 = vpack.c.bf16 %v2475_v35, %v2475_v35 }
0x1714   :  { %1572 = vrot.lane.b32.xlu2 %v1570_v58, %s2023_s1 }
0x171c   :  { %1172 = vperm.xlu2 %1930, %v1170_v38  }
0x176e   :  { %v1573_v36 = vpop.permute.xlu2 %1572 }
0x176f   :  { %1874 = vmatmul.msk.bf16.vlgmr.msrb.gmra.mxu3 %vm1049_vm10, %v1573_v36 }
0x1776   :  { %v1173_v19 = vpop.permute.xlu2 %1172 }
0x1777   :  { %vm1174_vm7 = vcmp.eq.s32.totalorder %v1173_v19, 1 }
0x17f2   :  { %v1586_v42 = vpop.f32.mrf.mxu3 }
0x17f3   :  { %v1590_v18 = vadd.f32 %v1586_v42, %v1089_v41 }
0x17f5   :  { %1991 = vtanh.f32 %v1590_v18  ;;  %v1875_v44 = vmul.f32 -1.442695, %v1590_v18 }
0x17f7   :  { %1993 = vpow2.f32 %v1875_v44 }
0x17fa   :  { %v1588_v43 = vpop.f32.mrf.mxu3 }
0x17fb   :  { %v1992_v51 = vpop.eup %1991 }
0x17fc   :  { %1613 = vrot.lane.b32.xlu0 %v1992_v51, %s2024_s2 }
0x17fd   :  { %v1994_v45 = vpop.eup %1993 }
0x17fe   :  { %v1594_v46 = vadd.f32 1.0, %v1994_v45 }
0x1800   :  { %1995 = vrcp.f32 %v1594_v46  ;;  %v1606_v50 = vand.u32 2147483648, %v1594_v46  ;;  %vm1600_vm14 = vweird.f32 %v1594_v46  ;;  %v1604_v61 = vand.u32 2147483647, %v1594_v46 }
0x1802   :  { %v1607_v2 = vor.u32 1.1754944e-38, %v1606_v50  ;;  %vm1605_vm2 = vcmp.eq.f32.partialorder %v1604_v61, 8.507059e+37 }
0x1804   :  { %1176 = vrot.lane.b32.xlu0 %v2368_v24, %s2025_s23  ;;  %v1304_v24 = vsel %vm1303_vm15, 1, %v2019_v55  ;;  %v1905_v55 = vld [vmem:[%s2531_s14] sm:$0xff] }
0x1805   :  { %1306 = vperm.xlu2 %1930, %v1304_v24   ;;  %1665 = vmatpush.bf16.msrb.mxu0 %v1905_v55 }
0x1806   :  { %v1996_v48 = vpop.eup %1995 }
0x1807   :  { %v1596_v3 = vmul.f32 %v1996_v48, %v1594_v46  ;;  %vm1601_vm13 = vweird.f32 %v1996_v48 }
0x1808   :  { %vm1602_vm1 = vmor %vm1600_vm14, %vm1601_vm13 }
0x1809   :  { %v1597_v52 = vsub.f32 1.0, %v1596_v3 }
0x180b   :  { %v1598_v59 = vmul.f32 %v1996_v48, %v1597_v52 }
0x180c   :  { %1371 = vperm.xlu0 %1932, %v1369_v49  }
0x180d   :  { %v1599_v60 = vadd.f32 %v1996_v48, %v1598_v59  ;;  %1501 = vperm.xlu2 %1930, %v1499_v11  }
0x180f   :  { %v1603_v63 = vsel %vm1602_vm1, %v1996_v48, %v1599_v60 }
0x1810   :  { %v1608_v8 = vsel %vm1605_vm2, %v1607_v2, %v1603_v63 }
0x1811   :  { %v1611_v34 = vmul.f32 %v1608_v8, %v2471_v33 }
0x1814   :  { %1631 = vperm.xlu0 %1932, %v1629_v62  }
0x185f   :  { %v1307_v53 = vpop.permute.xlu2 %1306 }
0x1860   :  { %vm1308_vm11 = vcmp.eq.s32.totalorder %v1307_v53, 1 }
0x1867   :  { %v1502_v28 = vpop.permute.xlu2 %1501 }
0x1868   :  { %vm1503_vm14 = vcmp.eq.s32.totalorder %v1502_v28, 1 }
0x186e   :  { %v1614_v5 = vpop.permute.xlu0 %1613 }
0x186f   :  { %v1616_v9 = vmul.f32 %v1614_v5, %v1608_v8 }
0x1871   :  { %1618 = vrot.lane.b32.xlu1 %v1616_v9, %s2023_s1 }
0x1876   :  { %v1177_v23 = vpop.permute.xlu0 %1176 }
0x1877   :  { %v1179_v26 = vsel %vm1174_vm7, %v2406_v30, %v1177_v23 }
0x1879   :  { %1241 = vperm.xlu1 %1931, %v1239_v17  }
0x187e   :  { %v1372_v27 = vpop.permute.xlu0 %1371 }
0x187f   :  { %vm1373_vm12 = vcmp.eq.s32.totalorder %v1372_v27, 1 }
0x1881   :  { %1436 = vperm.xlu1 %1931, %v1434_v12  }
0x1886   :  { %v1632_v32 = vpop.permute.xlu0 %1631 }
0x1887   :  { %vm1633_vm0 = vcmp.eq.s32.totalorder %v1632_v32, 1 }
0x1889   :  { %1566 = vperm.xlu1 %1931, %v1564_v13  }
0x18e3   :  { %v1619_v21 = vpop.permute.xlu1 %1618 }
0x18e4   :  { %v1621_v4 = vadd.f32 %v1619_v21, %v1611_v34 }
0x18e6   :  { %1997 = vtanh.f32 %v1621_v4 }
0x18eb   :  { %v1242_v20 = vpop.permute.xlu1 %1241 }
0x18ec   :  { %v1998_v16 = vpop.eup %1997  ;;  %vm1243_vm8 = vcmp.eq.s32.totalorder %v1242_v20, 1 }
0x18ed   :  { %1624 = vrot.lane.b32.xlu2 %v1998_v16, %s2024_s2  ;;  %v1244_v7 = vsel %vm1243_vm8, %v2418_v0, %v1179_v26 }
0x18ee   :  { %v1309_v10 = vsel %vm1308_vm11, %v2430_v31, %v1244_v7 }
0x18ef   :  { %v1374_v22 = vsel %vm1373_vm12, %v2442_v1, %v1309_v10 }
0x18f3   :  { %v1437_v25 = vpop.permute.xlu1 %1436 }
0x18f4   :  { %vm1438_vm13 = vcmp.eq.s32.totalorder %v1437_v25, 1 }
0x18f5   :  { %v1439_v54 = vsel %vm1438_vm13, %v2452_v56, %v1374_v22 }
0x18f6   :  { %v1504_v30 = vsel %vm1503_vm14, %v2462_v6, %v1439_v54  ;;  %v1690_v6 = vmul.f32 0.5, %v914_v39 }
0x18f8   :  { %v1691_v42 = vadd.f32 0.5, %v1690_v6 }
0x18fa   :  { %v1693_v45 = vperm.slane %v1691_v42, 0 }
0x18fb   :  { %v1567_v47 = vpop.permute.xlu1 %1566 }
0x18fc   :  { %vm1568_vm15 = vcmp.eq.s32.totalorder %v1567_v47, 1 }
0x18fd   :  { %v1569_v0 = vsel %vm1568_vm15, %v2475_v35, %v1504_v30 }
0x1947   :  { %v1625_v33 = vpop.permute.xlu2 %1624 }
0x1948   :  { %v1627_v57 = vmul.f32 %v1625_v33, %v1608_v8 }
0x194a   :  { %v1634_v15 = vsel %vm1633_vm0, %v1627_v57, %v1569_v0 }
0x194b   :  { %v1635_v58 = vpack.c.bf16 %v1634_v15, %v1634_v15 }
0x194d   :  { %1641 = vrot.lane.b32.xlu1 %v1635_v58, %s2023_s1 }
0x19bf   :  { %v1642_v31 = vpop.permute.xlu1 %1641 }
0x19c0   :  { %1884 = vmatmul.msk.bf16.vlgmr.msrb.gmra.mxu0 %vm1049_vm10, %v1642_v31 }
0x1a3d   :  { %v1667_v1 = vpop.f32.mrf.mxu0 }
0x1a3e   :  { %v1885_v36 = vmul.f32 -1.442695, %v1667_v1 }
0x1a40   :  { %1999 = vpow2.f32 %v1885_v36 }
0x1a45   :  { %v1669_v56 = vpop.f32.mrf.mxu0 }
0x1a46   :  { %v2000_v37 = vpop.eup %1999 }
0x1a47   :  { %v1674_v38 = vadd.f32 1.0, %v2000_v37 }
0x1a49   :  { %2001 = vrcp.f32 %v1674_v38  ;;  %v1686_v18 = vand.u32 2147483648, %v1674_v38  ;;  %v1684_v51 = vand.u32 2147483647, %v1674_v38  ;;  %vm1680_vm10 = vweird.f32 %v1674_v38 }
0x1a4b   :  { %v1687_v46 = vor.u32 1.1754944e-38, %v1686_v18  ;;  %vm1685_vm3 = vcmp.eq.f32.partialorder %v1684_v51, 8.507059e+37 }
0x1a4f   :  { %v2002_v40 = vpop.eup %2001 }
0x1a50   :  { %v1676_v35 = vmul.f32 %v2002_v40, %v1674_v38  ;;  %vm1681_vm1 = vweird.f32 %v2002_v40 }
0x1a51   :  { %vm1682_vm2 = vmor %vm1680_vm10, %vm1681_vm1 }
0x1a52   :  { %v1677_v41 = vsub.f32 1.0, %v1676_v35 }
0x1a54   :  { %v1678_v43 = vmul.f32 %v2002_v40, %v1677_v41 }
0x1a56   :  { %v1679_v44 = vadd.f32 %v2002_v40, %v1678_v43 }
0x1a58   :  { %v1683_v48 = vsel %vm1682_vm2, %v2002_v40, %v1679_v44 }
0x1a59   :  { %v1688_v49 = vsel %vm1685_vm3, %v1687_v46, %v1683_v48 }
0x1a5a   :  { %v1695_v3 = vmul.f32 %v1693_v45, %v1688_v49 }
0x1a5c   :  { %1696 = vst.msk [vmem:[%s2532_s15] sm:$0xff] %vm212_vm9, %v1695_v3 }
0x1a5d   :  { %1701 = vsyncmov [#allocation3] }
0x1a60   :  { %s1702_s27 = vpop.sfrf %1701 }
0x1a61   :  { %p1886_p0 = scmp.ne.s32.totalorder %s1702_s27, 0 }
0x1a63   :  { %1706 = shalt.err (%p1886_p0)  }
0x1a64   :  { %1708 = vsyncmov [#allocation3 + $0x1] }
0x1a67   :  { %s1709_s28 = vpop.sfrf %1708 }
0x1a68   :  { %p1887_p1 = scmp.ne.s32.totalorder %s1709_s28, 0 }
0x1a6a   :  { %1713 = shalt.err (%p1887_p1)  }

</bundles_post_ra>
